<compile_context>
chip_gen: v7x
topology: tpu7x:2x2x1
jax: 0.10.0
libtpu: 0.0.40
codegen_flags: <defaults>
</compile_context>

<pallas_src>
import jax
import jax.numpy as jnp
from jax.experimental import pallas as pl
from jax.experimental.pallas import tpu as pltpu


def make_seq2seq_kernel(Tx, Ty, Bp, Din, Dout, H, NXYP):
    """Fused encoder-LSTM -> decoder-LSTM -> Linear -> Sigmoid kernel."""
    G4 = 4 * H

    def kernel(xy_ref, w_ref, b_ref, out_ref, hn_ref, cn_ref):
        # ---- packed weight slab layout (rows, lane width = 4H) ----------
        #   [0, NXYP)            : stacked input-proj weight [wih_e^T; wih_d^T]
        #   [NXYP, NXYP+H)       : whh_e^T            (H, 4H)
        #   [NXYP+H, NXYP+2H)    : whh_d^T            (H, 4H)
        #   [NXYP+2H, NXYP+3H)   : wlin^T zero-padded (H, 4H), cols [0,Dout) valid
        w_in = xy_w = w_ref[0:NXYP, :]
        whh_e = w_ref[NXYP:NXYP + H, :]
        whh_d = w_ref[NXYP + H:NXYP + 2 * H, :]
        wlin = w_ref[NXYP + 2 * H:NXYP + 3 * H, :]

        bias = b_ref[...]                       # (3, 4H)
        b_e = bias[0:1, :]
        b_d = bias[1:2, :]
        b_lin = bias[2:3, :Dout]

        # ---- merged input projection: one matmul for BOTH sequences -----
        # xy rows [0, Tx*Bp) carry x in cols [0, Din); rows [Tx*Bp, ...) carry
        # y in cols [Din, Din+Dout); w_in is the stacked weight, so the block
        # structure makes the single product equal to the two projections.
        proj = jnp.dot(xy_ref[...], w_in, preferred_element_type=jnp.float32)
        xp = proj[0:Tx * Bp, :] + b_e                       # (Tx*Bp, 4H)
        yp = proj[Tx * Bp:(Tx + Ty) * Bp, :] + b_d          # (Ty*Bp, 4H)

        def lstm_step(pre, h, c, whh):
            # single matmul per step on the serial path (skipped when h==0)
            if h is None:
                gates = pre
            else:
                gates = pre + jnp.dot(h, whh,
                                      preferred_element_type=jnp.float32)
            # ONE full-vreg sigmoid; tanh only on the g block (EUP cut ~40%)
            sig = jax.nn.sigmoid(gates)
            i = sig[:, 0 * H:1 * H]
            f = sig[:, 1 * H:2 * H]
            o = sig[:, 3 * H:4 * H]
            g = jnp.tanh(gates[:, 2 * H:3 * H])
            c_new = i * g if c is None else f * c + i * g
            h_new = o * jnp.tanh(c_new)
            return h_new, c_new

        # ---------------- encoder (fully unrolled; Tx static) ------------
        h = c = None
        for t in range(Tx):
            h, c = lstm_step(xp[t * Bp:(t + 1) * Bp, :], h, c, whh_e)

        # hidden = (h_n, c_n) returned by the encoder
        hn_ref[...] = h
        cn_ref[...] = c

        # ------------- decoder (fully unrolled; init = encoder h,c) ------
        hs = []
        for t in range(Ty):
            h, c = lstm_step(yp[t * Bp:(t + 1) * Bp, :], h, c, whh_d)
            hs.append(h)
        hdec = jnp.concatenate(hs, axis=0)      # (Ty*Bp, H), stays in vregs

        # decoder_linear + sigmoid, hoisted out of the recurrence:
        # one (Ty*Bp, H) @ (H, 4H-padded) matmul and a single output store.
        lin = jnp.dot(hdec, wlin, preferred_element_type=jnp.float32)
        out_ref[...] = jax.nn.sigmoid(lin[:, :Dout] + b_lin)

    return kernel


def seq2seq_forward(x, y, params):
    """x: (B, Tx, Din), y: (B, Ty, Dout) — batch_first, like PyTorch.

    Returns (out, (h_n, c_n)) with out: (B, Ty, Dout),
    h_n / c_n: (num_layers=1, B, H).
    """
    (wih_e, whh_e, bih_e, bhh_e,
     wih_d, whh_d, bih_d, bhh_d,
     wlin, blin) = params

    B, Tx, Din = x.shape
    _, Ty, Dout = y.shape
    H = whh_e.shape[1]
    G4 = 4 * H
    Bp = max(8, ((B + 7) // 8) * 8)        # pad batch to a full f32 sublane tile
    NXY = Din + Dout
    NXYP = ((NXY + 7) // 8) * 8            # aligned row count for the proj block

    def to_time_major_padded(a, T, D):
        a_tm = jnp.transpose(a.astype(jnp.float32), (1, 0, 2))   # (T, B, D)
        if Bp != B:
            pad = jnp.zeros((T, Bp - B, D), jnp.float32)
            a_tm = jnp.concatenate([a_tm, pad], axis=1)
        return a_tm.reshape(T * Bp, D)

    x2d = to_time_major_padded(x, Tx, Din)     # (Tx*Bp, Din)
    y2d = to_time_major_padded(y, Ty, Dout)    # (Ty*Bp, Dout)

    # single block-structured input slab: one DMA instead of two
    xy2d = jnp.zeros((Tx * Bp + Ty * Bp, NXYP), jnp.float32)
    xy2d = xy2d.at[:Tx * Bp, :Din].set(x2d)
    xy2d = xy2d.at[Tx * Bp:, Din:NXY].set(y2d)

    # packed weight slab: one DMA instead of five
    w_slab = jnp.zeros((NXYP + 3 * H, G4), jnp.float32)
    w_slab = w_slab.at[:Din, :].set(wih_e.T.astype(jnp.float32))
    w_slab = w_slab.at[Din:NXY, :].set(wih_d.T.astype(jnp.float32))
    w_slab = w_slab.at[NXYP:NXYP + H, :].set(whh_e.T.astype(jnp.float32))
    w_slab = w_slab.at[NXYP + H:NXYP + 2 * H, :].set(whh_d.T.astype(jnp.float32))
    w_slab = w_slab.at[NXYP + 2 * H:NXYP + 3 * H, :Dout].set(
        wlin.T.astype(jnp.float32))

    # packed bias slab (the two LSTM biases are folded together)
    b_slab = jnp.zeros((3, G4), jnp.float32)
    b_slab = b_slab.at[0, :].set((bih_e + bhh_e).astype(jnp.float32))
    b_slab = b_slab.at[1, :].set((bih_d + bhh_d).astype(jnp.float32))
    b_slab = b_slab.at[2, :Dout].set(blin.astype(jnp.float32))

    kernel = make_seq2seq_kernel(Tx, Ty, Bp, Din, Dout, H, NXYP)
    vmem = pl.BlockSpec(memory_space=pltpu.MemorySpace.VMEM)

    flops = (2 * (Tx + Ty) * Bp * (NXYP + H) * G4    # projection + recurrence
             + 2 * Ty * Bp * H * G4)                 # tail Linear
    transcendentals = (Tx + Ty) * Bp * (G4 + 2 * H) + Ty * Bp * Dout
    bytes_accessed = 4 * (xy2d.size + w_slab.size + b_slab.size
                          + Ty * Bp * Dout + 2 * Bp * H)

    out2d, h_n, c_n = pl.pallas_call(
        kernel,
        out_shape=(
            jax.ShapeDtypeStruct((Ty * Bp, Dout), jnp.float32),
            jax.ShapeDtypeStruct((Bp, H), jnp.float32),
            jax.ShapeDtypeStruct((Bp, H), jnp.float32),
        ),
        in_specs=[vmem, vmem, vmem],
        out_specs=(vmem, vmem, vmem),
        cost_estimate=pl.CostEstimate(
            flops=flops,
            transcendentals=transcendentals,
            bytes_accessed=bytes_accessed),
    )(xy2d, w_slab, b_slab)

    out = out2d.reshape(Ty, Bp, Dout)[:, :B, :].transpose(1, 0, 2)  # (B,Ty,Dout)
    hidden = (h_n[:B][None, :, :], c_n[:B][None, :, :])             # (1, B, H)
    return out, hidden


# ---------------- pure-JAX reference (for correctness check) ----------------
def _lstm_ref(seq, h, c, wih, whh, bih, bhh, H):
    outs = []
    for t in range(seq.shape[1]):
        gates = seq[:, t, :] @ wih.T + bih + h @ whh.T + bhh
        i = jax.nn.sigmoid(gates[:, 0 * H:1 * H])
        f = jax.nn.sigmoid(gates[:, 1 * H:2 * H])
        g = jnp.tanh(gates[:, 2 * H:3 * H])
        o = jax.nn.sigmoid(gates[:, 3 * H:4 * H])
        c = f * c + i * g
        h = o * jnp.tanh(c)
        outs.append(h)
    return jnp.stack(outs, axis=1), h, c


def seq2seq_ref(x, y, params):
    (wih_e, whh_e, bih_e, bhh_e,
     wih_d, whh_d, bih_d, bhh_d,
     wlin, blin) = params
    B = x.shape[0]
    H = whh_e.shape[1]
    h0 = jnp.zeros((B, H), jnp.float32)
    c0 = jnp.zeros((B, H), jnp.float32)
    _, h_n, c_n = _lstm_ref(x, h0, c0, wih_e, whh_e, bih_e, bhh_e, H)
    dec_out, _, _ = _lstm_ref(y, h_n, c_n, wih_d, whh_d, bih_d, bhh_d, H)
    out = jax.nn.sigmoid(dec_out @ wlin.T + blin)
    return out, (h_n[None], c_n[None])


if __name__ == "__main__":
    # params equivalent to:
    # {'input_size': 4, 'output_size': 4, 'hidden_size': 32, 'num_layers': 1,
    #  'activation_function': 'sigmoid', 'model_type': 'seq2seq'}
    B, Tx, Ty = 2, 8, 8
    Din, Dout, H = 4, 4, 32

    key = jax.random.PRNGKey(0)
    ks = jax.random.split(key, 12)
    scale = 0.1
    params = (
        scale * jax.random.normal(ks[0], (4 * H, Din), jnp.float32),   # wih_e
        scale * jax.random.normal(ks[1], (4 * H, H), jnp.float32),     # whh_e
        scale * jax.random.normal(ks[2], (4 * H,), jnp.float32),       # bih_e
        scale * jax.random.normal(ks[3], (4 * H,), jnp.float32),       # bhh_e
        scale * jax.random.normal(ks[4], (4 * H, Dout), jnp.float32),  # wih_d
        scale * jax.random.normal(ks[5], (4 * H, H), jnp.float32),     # whh_d
        scale * jax.random.normal(ks[6], (4 * H,), jnp.float32),       # bih_d
        scale * jax.random.normal(ks[7], (4 * H,), jnp.float32),       # bhh_d
        scale * jax.random.normal(ks[8], (Dout, H), jnp.float32),      # wlin
        scale * jax.random.normal(ks[9], (Dout,), jnp.float32),        # blin
    )
    x = jax.random.normal(ks[10], (B, Tx, Din), jnp.float32)
    y = jax.random.normal(ks[11], (B, Ty, Dout), jnp.float32)

    out, (h_n, c_n) = jax.jit(seq2seq_forward)(x, y, params)
    jax.block_until_ready(out)
    jax.block_until_ready(h_n)
    jax.block_until_ready(c_n)

    out_r, (h_r, c_r) = seq2seq_ref(x, y, params)
    assert out.shape == (B, Ty, Dout)
    assert h_n.shape == (1, B, H) and c_n.shape == (1, B, H)
    assert jnp.allclose(out, out_r, atol=1e-5), "decoder output mismatch"
    assert jnp.allclose(h_n, h_r, atol=1e-5), "h_n mismatch"
    assert jnp.allclose(c_n, c_r, atol=1e-5), "c_n mismatch"

    # TODO(synk): multi-layer (num_layers>1) stacking and the GRU / plain-LSTM
    # model_type branches are not exercised; this kernel implements the
    # 'seq2seq' (LSTM enc/dec, num_layers=1, sigmoid) configuration.
    print("KERNEL_OK")
</pallas_src>

<mosaic_0001>
module attributes {stable_mosaic.version = 11 : i64} {
  func.func @kernel(%arg0: memref<128x8xf32, #tpu.memory_space<vmem>>, %arg1: memref<104x128xf32, #tpu.memory_space<vmem>>, %arg2: memref<3x128xf32, #tpu.memory_space<vmem>>, %arg3: memref<64x4xf32, #tpu.memory_space<vmem>>, %arg4: memref<8x32xf32, #tpu.memory_space<vmem>>, %arg5: memref<8x32xf32, #tpu.memory_space<vmem>>) attributes {dimension_semantics = [], scalar_prefetch = 0 : i64, scratch_operands = 0 : i64, tpu.core_type = #tpu.core_type<tc>} {
    %c0 = arith.constant 0 : index
    %c0_0 = arith.constant 0 : index
    %0 = vector.load %arg1[%c0, %c0_0] : memref<104x128xf32, #tpu.memory_space<vmem>>, vector<8x128xf32>
    %c8 = arith.constant 8 : index
    %c0_1 = arith.constant 0 : index
    %1 = vector.load %arg1[%c8, %c0_1] : memref<104x128xf32, #tpu.memory_space<vmem>>, vector<32x128xf32>
    %c40 = arith.constant 40 : index
    %c0_2 = arith.constant 0 : index
    %2 = vector.load %arg1[%c40, %c0_2] : memref<104x128xf32, #tpu.memory_space<vmem>>, vector<32x128xf32>
    %c72 = arith.constant 72 : index
    %c0_3 = arith.constant 0 : index
    %3 = vector.load %arg1[%c72, %c0_3] : memref<104x128xf32, #tpu.memory_space<vmem>>, vector<32x128xf32>
    %c0_4 = arith.constant 0 : index
    %c0_5 = arith.constant 0 : index
    %4 = vector.load %arg2[%c0_4, %c0_5] : memref<3x128xf32, #tpu.memory_space<vmem>>, vector<3x128xf32>
    %5 = vector.extract_strided_slice %4 {offsets = [0, 0], sizes = [1, 128], strides = [1, 1]} : vector<3x128xf32> to vector<1x128xf32>
    %6 = vector.extract_strided_slice %4 {offsets = [1, 0], sizes = [1, 128], strides = [1, 1]} : vector<3x128xf32> to vector<1x128xf32>
    %7 = vector.extract_strided_slice %4 {offsets = [2, 0], sizes = [1, 4], strides = [1, 1]} : vector<3x128xf32> to vector<1x4xf32>
    %c0_6 = arith.constant 0 : index
    %c0_7 = arith.constant 0 : index
    %8 = vector.load %arg0[%c0_6, %c0_7] : memref<128x8xf32, #tpu.memory_space<vmem>>, vector<128x8xf32>
    %cst = arith.constant dense<0.000000e+00> : vector<128x128xf32>
    %9 = tpu.matmul %8, %0, %cst {dimension_numbers = #tpu.dot_dimension_numbers<[1], [0], [0], [1], [0, 0, 1, 1], [], []>} : vector<128x8xf32>, vector<8x128xf32>, vector<128x128xf32> -> vector<128x128xf32>
    %10 = vector.extract_strided_slice %9 {offsets = [0, 0], sizes = [64, 128], strides = [1, 1]} : vector<128x128xf32> to vector<64x128xf32>
    %11 = vector.broadcast %5 : vector<1x128xf32> to vector<64x128xf32>
    %12 = arith.addf %10, %11 : vector<64x128xf32>
    %13 = vector.extract_strided_slice %9 {offsets = [64, 0], sizes = [64, 128], strides = [1, 1]} : vector<128x128xf32> to vector<64x128xf32>
    %14 = vector.broadcast %6 : vector<1x128xf32> to vector<64x128xf32>
    %15 = arith.addf %13, %14 : vector<64x128xf32>
    %16 = vector.extract_strided_slice %12 {offsets = [0, 0], sizes = [8, 128], strides = [1, 1]} : vector<64x128xf32> to vector<8x128xf32>
    %17 = arith.negf %16 : vector<8x128xf32>
    %18 = math.exp %17 : vector<8x128xf32>
    %cst_8 = arith.constant 1.000000e+00 : f32
    %19 = vector.broadcast %cst_8 : f32 to vector<8x128xf32>
    %20 = arith.addf %19, %18 : vector<8x128xf32>
    %21 = arith.divf %19, %20 : vector<8x128xf32>
    %22 = vector.extract_strided_slice %21 {offsets = [0, 0], sizes = [8, 32], strides = [1, 1]} : vector<8x128xf32> to vector<8x32xf32>
    %23 = vector.extract_strided_slice %21 {offsets = [0, 96], sizes = [8, 32], strides = [1, 1]} : vector<8x128xf32> to vector<8x32xf32>
    %24 = vector.extract_strided_slice %16 {offsets = [0, 64], sizes = [8, 32], strides = [1, 1]} : vector<8x128xf32> to vector<8x32xf32>
    %25 = math.tanh %24 : vector<8x32xf32>
    %26 = arith.mulf %22, %25 : vector<8x32xf32>
    %27 = math.tanh %26 : vector<8x32xf32>
    %28 = arith.mulf %23, %27 : vector<8x32xf32>
    %29 = vector.extract_strided_slice %12 {offsets = [8, 0], sizes = [8, 128], strides = [1, 1]} : vector<64x128xf32> to vector<8x128xf32>
    %cst_9 = arith.constant dense<0.000000e+00> : vector<8x128xf32>
    %30 = tpu.matmul %28, %1, %cst_9 {dimension_numbers = #tpu.dot_dimension_numbers<[1], [0], [0], [1], [0, 0, 1, 1], [], []>} : vector<8x32xf32>, vector<32x128xf32>, vector<8x128xf32> -> vector<8x128xf32>
    %31 = arith.addf %29, %30 : vector<8x128xf32>
    %32 = arith.negf %31 : vector<8x128xf32>
    %33 = math.exp %32 : vector<8x128xf32>
    %cst_10 = arith.constant 1.000000e+00 : f32
    %34 = vector.broadcast %cst_10 : f32 to vector<8x128xf32>
    %35 = arith.addf %34, %33 : vector<8x128xf32>
    %36 = arith.divf %34, %35 : vector<8x128xf32>
    %37 = vector.extract_strided_slice %36 {offsets = [0, 0], sizes = [8, 32], strides = [1, 1]} : vector<8x128xf32> to vector<8x32xf32>
    %38 = vector.extract_strided_slice %36 {offsets = [0, 32], sizes = [8, 32], strides = [1, 1]} : vector<8x128xf32> to vector<8x32xf32>
    %39 = vector.extract_strided_slice %36 {offsets = [0, 96], sizes = [8, 32], strides = [1, 1]} : vector<8x128xf32> to vector<8x32xf32>
    %40 = vector.extract_strided_slice %31 {offsets = [0, 64], sizes = [8, 32], strides = [1, 1]} : vector<8x128xf32> to vector<8x32xf32>
    %41 = math.tanh %40 : vector<8x32xf32>
    %42 = arith.mulf %38, %26 : vector<8x32xf32>
    %43 = arith.mulf %37, %41 : vector<8x32xf32>
    %44 = arith.addf %42, %43 : vector<8x32xf32>
    %45 = math.tanh %44 : vector<8x32xf32>
    %46 = arith.mulf %39, %45 : vector<8x32xf32>
    %47 = vector.extract_strided_slice %12 {offsets = [16, 0], sizes = [8, 128], strides = [1, 1]} : vector<64x128xf32> to vector<8x128xf32>
    %cst_11 = arith.constant dense<0.000000e+00> : vector<8x128xf32>
    %48 = tpu.matmul %46, %1, %cst_11 {dimension_numbers = #tpu.dot_dimension_numbers<[1], [0], [0], [1], [0, 0, 1, 1], [], []>} : vector<8x32xf32>, vector<32x128xf32>, vector<8x128xf32> -> vector<8x128xf32>
    %49 = arith.addf %47, %48 : vector<8x128xf32>
    %50 = arith.negf %49 : vector<8x128xf32>
    %51 = math.exp %50 : vector<8x128xf32>
    %cst_12 = arith.constant 1.000000e+00 : f32
    %52 = vector.broadcast %cst_12 : f32 to vector<8x128xf32>
    %53 = arith.addf %52, %51 : vector<8x128xf32>
    %54 = arith.divf %52, %53 : vector<8x128xf32>
    %55 = vector.extract_strided_slice %54 {offsets = [0, 0], sizes = [8, 32], strides = [1, 1]} : vector<8x128xf32> to vector<8x32xf32>
    %56 = vector.extract_strided_slice %54 {offsets = [0, 32], sizes = [8, 32], strides = [1, 1]} : vector<8x128xf32> to vector<8x32xf32>
    %57 = vector.extract_strided_slice %54 {offsets = [0, 96], sizes = [8, 32], strides = [1, 1]} : vector<8x128xf32> to vector<8x32xf32>
    %58 = vector.extract_strided_slice %49 {offsets = [0, 64], sizes = [8, 32], strides = [1, 1]} : vector<8x128xf32> to vector<8x32xf32>
    %59 = math.tanh %58 : vector<8x32xf32>
    %60 = arith.mulf %56, %44 : vector<8x32xf32>
    %61 = arith.mulf %55, %59 : vector<8x32xf32>
    %62 = arith.addf %60, %61 : vector<8x32xf32>
    %63 = math.tanh %62 : vector<8x32xf32>
    %64 = arith.mulf %57, %63 : vector<8x32xf32>
    %65 = vector.extract_strided_slice %12 {offsets = [24, 0], sizes = [8, 128], strides = [1, 1]} : vector<64x128xf32> to vector<8x128xf32>
    %cst_13 = arith.constant dense<0.000000e+00> : vector<8x128xf32>
    %66 = tpu.matmul %64, %1, %cst_13 {dimension_numbers = #tpu.dot_dimension_numbers<[1], [0], [0], [1], [0, 0, 1, 1], [], []>} : vector<8x32xf32>, vector<32x128xf32>, vector<8x128xf32> -> vector<8x128xf32>
    %67 = arith.addf %65, %66 : vector<8x128xf32>
    %68 = arith.negf %67 : vector<8x128xf32>
    %69 = math.exp %68 : vector<8x128xf32>
    %cst_14 = arith.constant 1.000000e+00 : f32
    %70 = vector.broadcast %cst_14 : f32 to vector<8x128xf32>
    %71 = arith.addf %70, %69 : vector<8x128xf32>
    %72 = arith.divf %70, %71 : vector<8x128xf32>
    %73 = vector.extract_strided_slice %72 {offsets = [0, 0], sizes = [8, 32], strides = [1, 1]} : vector<8x128xf32> to vector<8x32xf32>
    %74 = vector.extract_strided_slice %72 {offsets = [0, 32], sizes = [8, 32], strides = [1, 1]} : vector<8x128xf32> to vector<8x32xf32>
    %75 = vector.extract_strided_slice %72 {offsets = [0, 96], sizes = [8, 32], strides = [1, 1]} : vector<8x128xf32> to vector<8x32xf32>
    %76 = vector.extract_strided_slice %67 {offsets = [0, 64], sizes = [8, 32], strides = [1, 1]} : vector<8x128xf32> to vector<8x32xf32>
    %77 = math.tanh %76 : vector<8x32xf32>
    %78 = arith.mulf %74, %62 : vector<8x32xf32>
    %79 = arith.mulf %73, %77 : vector<8x32xf32>
    %80 = arith.addf %78, %79 : vector<8x32xf32>
    %81 = math.tanh %80 : vector<8x32xf32>
    %82 = arith.mulf %75, %81 : vector<8x32xf32>
    %83 = vector.extract_strided_slice %12 {offsets = [32, 0], sizes = [8, 128], strides = [1, 1]} : vector<64x128xf32> to vector<8x128xf32>
    %cst_15 = arith.constant dense<0.000000e+00> : vector<8x128xf32>
    %84 = tpu.matmul %82, %1, %cst_15 {dimension_numbers = #tpu.dot_dimension_numbers<[1], [0], [0], [1], [0, 0, 1, 1], [], []>} : vector<8x32xf32>, vector<32x128xf32>, vector<8x128xf32> -> vector<8x128xf32>
    %85 = arith.addf %83, %84 : vector<8x128xf32>
    %86 = arith.negf %85 : vector<8x128xf32>
    %87 = math.exp %86 : vector<8x128xf32>
    %cst_16 = arith.constant 1.000000e+00 : f32
    %88 = vector.broadcast %cst_16 : f32 to vector<8x128xf32>
    %89 = arith.addf %88, %87 : vector<8x128xf32>
    %90 = arith.divf %88, %89 : vector<8x128xf32>
    %91 = vector.extract_strided_slice %90 {offsets = [0, 0], sizes = [8, 32], strides = [1, 1]} : vector<8x128xf32> to vector<8x32xf32>
    %92 = vector.extract_strided_slice %90 {offsets = [0, 32], sizes = [8, 32], strides = [1, 1]} : vector<8x128xf32> to vector<8x32xf32>
    %93 = vector.extract_strided_slice %90 {offsets = [0, 96], sizes = [8, 32], strides = [1, 1]} : vector<8x128xf32> to vector<8x32xf32>
    %94 = vector.extract_strided_slice %85 {offsets = [0, 64], sizes = [8, 32], strides = [1, 1]} : vector<8x128xf32> to vector<8x32xf32>
    %95 = math.tanh %94 : vector<8x32xf32>
    %96 = arith.mulf %92, %80 : vector<8x32xf32>
    %97 = arith.mulf %91, %95 : vector<8x32xf32>
    %98 = arith.addf %96, %97 : vector<8x32xf32>
    %99 = math.tanh %98 : vector<8x32xf32>
    %100 = arith.mulf %93, %99 : vector<8x32xf32>
    %101 = vector.extract_strided_slice %12 {offsets = [40, 0], sizes = [8, 128], strides = [1, 1]} : vector<64x128xf32> to vector<8x128xf32>
    %cst_17 = arith.constant dense<0.000000e+00> : vector<8x128xf32>
    %102 = tpu.matmul %100, %1, %cst_17 {dimension_numbers = #tpu.dot_dimension_numbers<[1], [0], [0], [1], [0, 0, 1, 1], [], []>} : vector<8x32xf32>, vector<32x128xf32>, vector<8x128xf32> -> vector<8x128xf32>
    %103 = arith.addf %101, %102 : vector<8x128xf32>
    %104 = arith.negf %103 : vector<8x128xf32>
    %105 = math.exp %104 : vector<8x128xf32>
    %cst_18 = arith.constant 1.000000e+00 : f32
    %106 = vector.broadcast %cst_18 : f32 to vector<8x128xf32>
    %107 = arith.addf %106, %105 : vector<8x128xf32>
    %108 = arith.divf %106, %107 : vector<8x128xf32>
    %109 = vector.extract_strided_slice %108 {offsets = [0, 0], sizes = [8, 32], strides = [1, 1]} : vector<8x128xf32> to vector<8x32xf32>
    %110 = vector.extract_strided_slice %108 {offsets = [0, 32], sizes = [8, 32], strides = [1, 1]} : vector<8x128xf32> to vector<8x32xf32>
    %111 = vector.extract_strided_slice %108 {offsets = [0, 96], sizes = [8, 32], strides = [1, 1]} : vector<8x128xf32> to vector<8x32xf32>
    %112 = vector.extract_strided_slice %103 {offsets = [0, 64], sizes = [8, 32], strides = [1, 1]} : vector<8x128xf32> to vector<8x32xf32>
    %113 = math.tanh %112 : vector<8x32xf32>
    %114 = arith.mulf %110, %98 : vector<8x32xf32>
    %115 = arith.mulf %109, %113 : vector<8x32xf32>
    %116 = arith.addf %114, %115 : vector<8x32xf32>
    %117 = math.tanh %116 : vector<8x32xf32>
    %118 = arith.mulf %111, %117 : vector<8x32xf32>
    %119 = vector.extract_strided_slice %12 {offsets = [48, 0], sizes = [8, 128], strides = [1, 1]} : vector<64x128xf32> to vector<8x128xf32>
    %cst_19 = arith.constant dense<0.000000e+00> : vector<8x128xf32>
    %120 = tpu.matmul %118, %1, %cst_19 {dimension_numbers = #tpu.dot_dimension_numbers<[1], [0], [0], [1], [0, 0, 1, 1], [], []>} : vector<8x32xf32>, vector<32x128xf32>, vector<8x128xf32> -> vector<8x128xf32>
    %121 = arith.addf %119, %120 : vector<8x128xf32>
    %122 = arith.negf %121 : vector<8x128xf32>
    %123 = math.exp %122 : vector<8x128xf32>
    %cst_20 = arith.constant 1.000000e+00 : f32
    %124 = vector.broadcast %cst_20 : f32 to vector<8x128xf32>
    %125 = arith.addf %124, %123 : vector<8x128xf32>
    %126 = arith.divf %124, %125 : vector<8x128xf32>
    %127 = vector.extract_strided_slice %126 {offsets = [0, 0], sizes = [8, 32], strides = [1, 1]} : vector<8x128xf32> to vector<8x32xf32>
    %128 = vector.extract_strided_slice %126 {offsets = [0, 32], sizes = [8, 32], strides = [1, 1]} : vector<8x128xf32> to vector<8x32xf32>
    %129 = vector.extract_strided_slice %126 {offsets = [0, 96], sizes = [8, 32], strides = [1, 1]} : vector<8x128xf32> to vector<8x32xf32>
    %130 = vector.extract_strided_slice %121 {offsets = [0, 64], sizes = [8, 32], strides = [1, 1]} : vector<8x128xf32> to vector<8x32xf32>
    %131 = math.tanh %130 : vector<8x32xf32>
    %132 = arith.mulf %128, %116 : vector<8x32xf32>
    %133 = arith.mulf %127, %131 : vector<8x32xf32>
    %134 = arith.addf %132, %133 : vector<8x32xf32>
    %135 = math.tanh %134 : vector<8x32xf32>
    %136 = arith.mulf %129, %135 : vector<8x32xf32>
    %137 = vector.extract_strided_slice %12 {offsets = [56, 0], sizes = [8, 128], strides = [1, 1]} : vector<64x128xf32> to vector<8x128xf32>
    %cst_21 = arith.constant dense<0.000000e+00> : vector<8x128xf32>
    %138 = tpu.matmul %136, %1, %cst_21 {dimension_numbers = #tpu.dot_dimension_numbers<[1], [0], [0], [1], [0, 0, 1, 1], [], []>} : vector<8x32xf32>, vector<32x128xf32>, vector<8x128xf32> -> vector<8x128xf32>
    %139 = arith.addf %137, %138 : vector<8x128xf32>
    %140 = arith.negf %139 : vector<8x128xf32>
    %141 = math.exp %140 : vector<8x128xf32>
    %cst_22 = arith.constant 1.000000e+00 : f32
    %142 = vector.broadcast %cst_22 : f32 to vector<8x128xf32>
    %143 = arith.addf %142, %141 : vector<8x128xf32>
    %144 = arith.divf %142, %143 : vector<8x128xf32>
    %145 = vector.extract_strided_slice %144 {offsets = [0, 0], sizes = [8, 32], strides = [1, 1]} : vector<8x128xf32> to vector<8x32xf32>
    %146 = vector.extract_strided_slice %144 {offsets = [0, 32], sizes = [8, 32], strides = [1, 1]} : vector<8x128xf32> to vector<8x32xf32>
    %147 = vector.extract_strided_slice %144 {offsets = [0, 96], sizes = [8, 32], strides = [1, 1]} : vector<8x128xf32> to vector<8x32xf32>
    %148 = vector.extract_strided_slice %139 {offsets = [0, 64], sizes = [8, 32], strides = [1, 1]} : vector<8x128xf32> to vector<8x32xf32>
    %149 = math.tanh %148 : vector<8x32xf32>
    %150 = arith.mulf %146, %134 : vector<8x32xf32>
    %151 = arith.mulf %145, %149 : vector<8x32xf32>
    %152 = arith.addf %150, %151 : vector<8x32xf32>
    %153 = math.tanh %152 : vector<8x32xf32>
    %154 = arith.mulf %147, %153 : vector<8x32xf32>
    %c0_23 = arith.constant 0 : index
    %c0_24 = arith.constant 0 : index
    %155 = vector.load %arg4[%c0_23, %c0_24] : memref<8x32xf32, #tpu.memory_space<vmem>>, vector<8x32xf32>
    tpu.vector_store %arg4[%c0_23, %c0_24], %154 {strides = array<i32>} : memref<8x32xf32, #tpu.memory_space<vmem>>, vector<8x32xf32>,
    %c0_25 = arith.constant 0 : index
    %c0_26 = arith.constant 0 : index
    %156 = vector.load %arg5[%c0_25, %c0_26] : memref<8x32xf32, #tpu.memory_space<vmem>>, vector<8x32xf32>
    tpu.vector_store %arg5[%c0_25, %c0_26], %152 {strides = array<i32>} : memref<8x32xf32, #tpu.memory_space<vmem>>, vector<8x32xf32>,
    %157 = vector.extract_strided_slice %15 {offsets = [0, 0], sizes = [8, 128], strides = [1, 1]} : vector<64x128xf32> to vector<8x128xf32>
    %cst_27 = arith.constant dense<0.000000e+00> : vector<8x128xf32>
    %158 = tpu.matmul %154, %2, %cst_27 {dimension_numbers = #tpu.dot_dimension_numbers<[1], [0], [0], [1], [0, 0, 1, 1], [], []>} : vector<8x32xf32>, vector<32x128xf32>, vector<8x128xf32> -> vector<8x128xf32>
    %159 = arith.addf %157, %158 : vector<8x128xf32>
    %160 = arith.negf %159 : vector<8x128xf32>
    %161 = math.exp %160 : vector<8x128xf32>
    %cst_28 = arith.constant 1.000000e+00 : f32
    %162 = vector.broadcast %cst_28 : f32 to vector<8x128xf32>
    %163 = arith.addf %162, %161 : vector<8x128xf32>
    %164 = arith.divf %162, %163 : vector<8x128xf32>
    %165 = vector.extract_strided_slice %164 {offsets = [0, 0], sizes = [8, 32], strides = [1, 1]} : vector<8x128xf32> to vector<8x32xf32>
    %166 = vector.extract_strided_slice %164 {offsets = [0, 32], sizes = [8, 32], strides = [1, 1]} : vector<8x128xf32> to vector<8x32xf32>
    %167 = vector.extract_strided_slice %164 {offsets = [0, 96], sizes = [8, 32], strides = [1, 1]} : vector<8x128xf32> to vector<8x32xf32>
    %168 = vector.extract_strided_slice %159 {offsets = [0, 64], sizes = [8, 32], strides = [1, 1]} : vector<8x128xf32> to vector<8x32xf32>
    %169 = math.tanh %168 : vector<8x32xf32>
    %170 = arith.mulf %166, %152 : vector<8x32xf32>
    %171 = arith.mulf %165, %169 : vector<8x32xf32>
    %172 = arith.addf %170, %171 : vector<8x32xf32>
    %173 = math.tanh %172 : vector<8x32xf32>
    %174 = arith.mulf %167, %173 : vector<8x32xf32>
    %175 = vector.extract_strided_slice %15 {offsets = [8, 0], sizes = [8, 128], strides = [1, 1]} : vector<64x128xf32> to vector<8x128xf32>
    %cst_29 = arith.constant dense<0.000000e+00> : vector<8x128xf32>
    %176 = tpu.matmul %174, %2, %cst_29 {dimension_numbers = #tpu.dot_dimension_numbers<[1], [0], [0], [1], [0, 0, 1, 1], [], []>} : vector<8x32xf32>, vector<32x128xf32>, vector<8x128xf32> -> vector<8x128xf32>
    %177 = arith.addf %175, %176 : vector<8x128xf32>
    %178 = arith.negf %177 : vector<8x128xf32>
    %179 = math.exp %178 : vector<8x128xf32>
    %cst_30 = arith.constant 1.000000e+00 : f32
    %180 = vector.broadcast %cst_30 : f32 to vector<8x128xf32>
    %181 = arith.addf %180, %179 : vector<8x128xf32>
    %182 = arith.divf %180, %181 : vector<8x128xf32>
    %183 = vector.extract_strided_slice %182 {offsets = [0, 0], sizes = [8, 32], strides = [1, 1]} : vector<8x128xf32> to vector<8x32xf32>
    %184 = vector.extract_strided_slice %182 {offsets = [0, 32], sizes = [8, 32], strides = [1, 1]} : vector<8x128xf32> to vector<8x32xf32>
    %185 = vector.extract_strided_slice %182 {offsets = [0, 96], sizes = [8, 32], strides = [1, 1]} : vector<8x128xf32> to vector<8x32xf32>
    %186 = vector.extract_strided_slice %177 {offsets = [0, 64], sizes = [8, 32], strides = [1, 1]} : vector<8x128xf32> to vector<8x32xf32>
    %187 = math.tanh %186 : vector<8x32xf32>
    %188 = arith.mulf %184, %172 : vector<8x32xf32>
    %189 = arith.mulf %183, %187 : vector<8x32xf32>
    %190 = arith.addf %188, %189 : vector<8x32xf32>
    %191 = math.tanh %190 : vector<8x32xf32>
    %192 = arith.mulf %185, %191 : vector<8x32xf32>
    %193 = vector.extract_strided_slice %15 {offsets = [16, 0], sizes = [8, 128], strides = [1, 1]} : vector<64x128xf32> to vector<8x128xf32>
    %cst_31 = arith.constant dense<0.000000e+00> : vector<8x128xf32>
    %194 = tpu.matmul %192, %2, %cst_31 {dimension_numbers = #tpu.dot_dimension_numbers<[1], [0], [0], [1], [0, 0, 1, 1], [], []>} : vector<8x32xf32>, vector<32x128xf32>, vector<8x128xf32> -> vector<8x128xf32>
    %195 = arith.addf %193, %194 : vector<8x128xf32>
    %196 = arith.negf %195 : vector<8x128xf32>
    %197 = math.exp %196 : vector<8x128xf32>
    %cst_32 = arith.constant 1.000000e+00 : f32
    %198 = vector.broadcast %cst_32 : f32 to vector<8x128xf32>
    %199 = arith.addf %198, %197 : vector<8x128xf32>
    %200 = arith.divf %198, %199 : vector<8x128xf32>
    %201 = vector.extract_strided_slice %200 {offsets = [0, 0], sizes = [8, 32], strides = [1, 1]} : vector<8x128xf32> to vector<8x32xf32>
    %202 = vector.extract_strided_slice %200 {offsets = [0, 32], sizes = [8, 32], strides = [1, 1]} : vector<8x128xf32> to vector<8x32xf32>
    %203 = vector.extract_strided_slice %200 {offsets = [0, 96], sizes = [8, 32], strides = [1, 1]} : vector<8x128xf32> to vector<8x32xf32>
    %204 = vector.extract_strided_slice %195 {offsets = [0, 64], sizes = [8, 32], strides = [1, 1]} : vector<8x128xf32> to vector<8x32xf32>
    %205 = math.tanh %204 : vector<8x32xf32>
    %206 = arith.mulf %202, %190 : vector<8x32xf32>
    %207 = arith.mulf %201, %205 : vector<8x32xf32>
    %208 = arith.addf %206, %207 : vector<8x32xf32>
    %209 = math.tanh %208 : vector<8x32xf32>
    %210 = arith.mulf %203, %209 : vector<8x32xf32>
    %211 = vector.extract_strided_slice %15 {offsets = [24, 0], sizes = [8, 128], strides = [1, 1]} : vector<64x128xf32> to vector<8x128xf32>
    %cst_33 = arith.constant dense<0.000000e+00> : vector<8x128xf32>
    %212 = tpu.matmul %210, %2, %cst_33 {dimension_numbers = #tpu.dot_dimension_numbers<[1], [0], [0], [1], [0, 0, 1, 1], [], []>} : vector<8x32xf32>, vector<32x128xf32>, vector<8x128xf32> -> vector<8x128xf32>
    %213 = arith.addf %211, %212 : vector<8x128xf32>
    %214 = arith.negf %213 : vector<8x128xf32>
    %215 = math.exp %214 : vector<8x128xf32>
    %cst_34 = arith.constant 1.000000e+00 : f32
    %216 = vector.broadcast %cst_34 : f32 to vector<8x128xf32>
    %217 = arith.addf %216, %215 : vector<8x128xf32>
    %218 = arith.divf %216, %217 : vector<8x128xf32>
    %219 = vector.extract_strided_slice %218 {offsets = [0, 0], sizes = [8, 32], strides = [1, 1]} : vector<8x128xf32> to vector<8x32xf32>
    %220 = vector.extract_strided_slice %218 {offsets = [0, 32], sizes = [8, 32], strides = [1, 1]} : vector<8x128xf32> to vector<8x32xf32>
    %221 = vector.extract_strided_slice %218 {offsets = [0, 96], sizes = [8, 32], strides = [1, 1]} : vector<8x128xf32> to vector<8x32xf32>
    %222 = vector.extract_strided_slice %213 {offsets = [0, 64], sizes = [8, 32], strides = [1, 1]} : vector<8x128xf32> to vector<8x32xf32>
    %223 = math.tanh %222 : vector<8x32xf32>
    %224 = arith.mulf %220, %208 : vector<8x32xf32>
    %225 = arith.mulf %219, %223 : vector<8x32xf32>
    %226 = arith.addf %224, %225 : vector<8x32xf32>
    %227 = math.tanh %226 : vector<8x32xf32>
    %228 = arith.mulf %221, %227 : vector<8x32xf32>
    %229 = vector.extract_strided_slice %15 {offsets = [32, 0], sizes = [8, 128], strides = [1, 1]} : vector<64x128xf32> to vector<8x128xf32>
    %cst_35 = arith.constant dense<0.000000e+00> : vector<8x128xf32>
    %230 = tpu.matmul %228, %2, %cst_35 {dimension_numbers = #tpu.dot_dimension_numbers<[1], [0], [0], [1], [0, 0, 1, 1], [], []>} : vector<8x32xf32>, vector<32x128xf32>, vector<8x128xf32> -> vector<8x128xf32>
    %231 = arith.addf %229, %230 : vector<8x128xf32>
    %232 = arith.negf %231 : vector<8x128xf32>
    %233 = math.exp %232 : vector<8x128xf32>
    %cst_36 = arith.constant 1.000000e+00 : f32
    %234 = vector.broadcast %cst_36 : f32 to vector<8x128xf32>
    %235 = arith.addf %234, %233 : vector<8x128xf32>
    %236 = arith.divf %234, %235 : vector<8x128xf32>
    %237 = vector.extract_strided_slice %236 {offsets = [0, 0], sizes = [8, 32], strides = [1, 1]} : vector<8x128xf32> to vector<8x32xf32>
    %238 = vector.extract_strided_slice %236 {offsets = [0, 32], sizes = [8, 32], strides = [1, 1]} : vector<8x128xf32> to vector<8x32xf32>
    %239 = vector.extract_strided_slice %236 {offsets = [0, 96], sizes = [8, 32], strides = [1, 1]} : vector<8x128xf32> to vector<8x32xf32>
    %240 = vector.extract_strided_slice %231 {offsets = [0, 64], sizes = [8, 32], strides = [1, 1]} : vector<8x128xf32> to vector<8x32xf32>
    %241 = math.tanh %240 : vector<8x32xf32>
    %242 = arith.mulf %238, %226 : vector<8x32xf32>
    %243 = arith.mulf %237, %241 : vector<8x32xf32>
    %244 = arith.addf %242, %243 : vector<8x32xf32>
    %245 = math.tanh %244 : vector<8x32xf32>
    %246 = arith.mulf %239, %245 : vector<8x32xf32>
    %247 = vector.extract_strided_slice %15 {offsets = [40, 0], sizes = [8, 128], strides = [1, 1]} : vector<64x128xf32> to vector<8x128xf32>
    %cst_37 = arith.constant dense<0.000000e+00> : vector<8x128xf32>
    %248 = tpu.matmul %246, %2, %cst_37 {dimension_numbers = #tpu.dot_dimension_numbers<[1], [0], [0], [1], [0, 0, 1, 1], [], []>} : vector<8x32xf32>, vector<32x128xf32>, vector<8x128xf32> -> vector<8x128xf32>
    %249 = arith.addf %247, %248 : vector<8x128xf32>
    %250 = arith.negf %249 : vector<8x128xf32>
    %251 = math.exp %250 : vector<8x128xf32>
    %cst_38 = arith.constant 1.000000e+00 : f32
    %252 = vector.broadcast %cst_38 : f32 to vector<8x128xf32>
    %253 = arith.addf %252, %251 : vector<8x128xf32>
    %254 = arith.divf %252, %253 : vector<8x128xf32>
    %255 = vector.extract_strided_slice %254 {offsets = [0, 0], sizes = [8, 32], strides = [1, 1]} : vector<8x128xf32> to vector<8x32xf32>
    %256 = vector.extract_strided_slice %254 {offsets = [0, 32], sizes = [8, 32], strides = [1, 1]} : vector<8x128xf32> to vector<8x32xf32>
    %257 = vector.extract_strided_slice %254 {offsets = [0, 96], sizes = [8, 32], strides = [1, 1]} : vector<8x128xf32> to vector<8x32xf32>
    %258 = vector.extract_strided_slice %249 {offsets = [0, 64], sizes = [8, 32], strides = [1, 1]} : vector<8x128xf32> to vector<8x32xf32>
    %259 = math.tanh %258 : vector<8x32xf32>
    %260 = arith.mulf %256, %244 : vector<8x32xf32>
    %261 = arith.mulf %255, %259 : vector<8x32xf32>
    %262 = arith.addf %260, %261 : vector<8x32xf32>
    %263 = math.tanh %262 : vector<8x32xf32>
    %264 = arith.mulf %257, %263 : vector<8x32xf32>
    %265 = vector.extract_strided_slice %15 {offsets = [48, 0], sizes = [8, 128], strides = [1, 1]} : vector<64x128xf32> to vector<8x128xf32>
    %cst_39 = arith.constant dense<0.000000e+00> : vector<8x128xf32>
    %266 = tpu.matmul %264, %2, %cst_39 {dimension_numbers = #tpu.dot_dimension_numbers<[1], [0], [0], [1], [0, 0, 1, 1], [], []>} : vector<8x32xf32>, vector<32x128xf32>, vector<8x128xf32> -> vector<8x128xf32>
    %267 = arith.addf %265, %266 : vector<8x128xf32>
    %268 = arith.negf %267 : vector<8x128xf32>
    %269 = math.exp %268 : vector<8x128xf32>
    %cst_40 = arith.constant 1.000000e+00 : f32
    %270 = vector.broadcast %cst_40 : f32 to vector<8x128xf32>
    %271 = arith.addf %270, %269 : vector<8x128xf32>
    %272 = arith.divf %270, %271 : vector<8x128xf32>
    %273 = vector.extract_strided_slice %272 {offsets = [0, 0], sizes = [8, 32], strides = [1, 1]} : vector<8x128xf32> to vector<8x32xf32>
    %274 = vector.extract_strided_slice %272 {offsets = [0, 32], sizes = [8, 32], strides = [1, 1]} : vector<8x128xf32> to vector<8x32xf32>
    %275 = vector.extract_strided_slice %272 {offsets = [0, 96], sizes = [8, 32], strides = [1, 1]} : vector<8x128xf32> to vector<8x32xf32>
    %276 = vector.extract_strided_slice %267 {offsets = [0, 64], sizes = [8, 32], strides = [1, 1]} : vector<8x128xf32> to vector<8x32xf32>
    %277 = math.tanh %276 : vector<8x32xf32>
    %278 = arith.mulf %274, %262 : vector<8x32xf32>
    %279 = arith.mulf %273, %277 : vector<8x32xf32>
    %280 = arith.addf %278, %279 : vector<8x32xf32>
    %281 = math.tanh %280 : vector<8x32xf32>
    %282 = arith.mulf %275, %281 : vector<8x32xf32>
    %283 = vector.extract_strided_slice %15 {offsets = [56, 0], sizes = [8, 128], strides = [1, 1]} : vector<64x128xf32> to vector<8x128xf32>
    %cst_41 = arith.constant dense<0.000000e+00> : vector<8x128xf32>
    %284 = tpu.matmul %282, %2, %cst_41 {dimension_numbers = #tpu.dot_dimension_numbers<[1], [0], [0], [1], [0, 0, 1, 1], [], []>} : vector<8x32xf32>, vector<32x128xf32>, vector<8x128xf32> -> vector<8x128xf32>
    %285 = arith.addf %283, %284 : vector<8x128xf32>
    %286 = arith.negf %285 : vector<8x128xf32>
    %287 = math.exp %286 : vector<8x128xf32>
    %cst_42 = arith.constant 1.000000e+00 : f32
    %288 = vector.broadcast %cst_42 : f32 to vector<8x128xf32>
    %289 = arith.addf %288, %287 : vector<8x128xf32>
    %290 = arith.divf %288, %289 : vector<8x128xf32>
    %291 = vector.extract_strided_slice %290 {offsets = [0, 0], sizes = [8, 32], strides = [1, 1]} : vector<8x128xf32> to vector<8x32xf32>
    %292 = vector.extract_strided_slice %290 {offsets = [0, 32], sizes = [8, 32], strides = [1, 1]} : vector<8x128xf32> to vector<8x32xf32>
    %293 = vector.extract_strided_slice %290 {offsets = [0, 96], sizes = [8, 32], strides = [1, 1]} : vector<8x128xf32> to vector<8x32xf32>
    %294 = vector.extract_strided_slice %285 {offsets = [0, 64], sizes = [8, 32], strides = [1, 1]} : vector<8x128xf32> to vector<8x32xf32>
    %295 = math.tanh %294 : vector<8x32xf32>
    %296 = arith.mulf %292, %280 : vector<8x32xf32>
    %297 = arith.mulf %291, %295 : vector<8x32xf32>
    %298 = arith.addf %296, %297 : vector<8x32xf32>
    %299 = math.tanh %298 : vector<8x32xf32>
    %300 = arith.mulf %293, %299 : vector<8x32xf32>
    %301 = tpu.concatenate %174, %192, %210, %228, %246, %264, %282, %300 in 0 : vector<8x32xf32>, vector<8x32xf32>, vector<8x32xf32>, vector<8x32xf32>, vector<8x32xf32>, vector<8x32xf32>, vector<8x32xf32>, vector<8x32xf32> -> vector<64x32xf32>
    %cst_43 = arith.constant dense<0.000000e+00> : vector<64x128xf32>
    %302 = tpu.matmul %301, %3, %cst_43 {dimension_numbers = #tpu.dot_dimension_numbers<[1], [0], [0], [1], [0, 0, 1, 1], [], []>} : vector<64x32xf32>, vector<32x128xf32>, vector<64x128xf32> -> vector<64x128xf32>
    %303 = vector.extract_strided_slice %302 {offsets = [0, 0], sizes = [64, 4], strides = [1, 1]} : vector<64x128xf32> to vector<64x4xf32>
    %304 = vector.broadcast %7 : vector<1x4xf32> to vector<64x4xf32>
    %305 = arith.addf %303, %304 : vector<64x4xf32>
    %306 = arith.negf %305 : vector<64x4xf32>
    %307 = math.exp %306 : vector<64x4xf32>
    %cst_44 = arith.constant 1.000000e+00 : f32
    %308 = vector.broadcast %cst_44 : f32 to vector<64x4xf32>
    %309 = arith.addf %308, %307 : vector<64x4xf32>
    %310 = arith.divf %308, %309 : vector<64x4xf32>
    %c0_45 = arith.constant 0 : index
    %c0_46 = arith.constant 0 : index
    %311 = vector.load %arg3[%c0_45, %c0_46] : memref<64x4xf32, #tpu.memory_space<vmem>>, vector<64x4xf32>
    tpu.vector_store %arg3[%c0_45, %c0_46], %310 {strides = array<i32>} : memref<64x4xf32, #tpu.memory_space<vmem>>, vector<64x4xf32>,
    return
  }
}

</mosaic_0001>

<bundles_post_ra>
// kernel: seq2seq_forward.1
= control target key start
LH: loop header
LB: loop body
LE: loop exit
PB: predicated region body
PF: predicated region fallthrough
CT: control target
= control target key end

     0   :  { %vm47_vm0 = vcmask 64512   ;;  %v241_v3 = vlaneseq  ;;  %s2629_s26 = smov 64   ;;  %v2630_v21 = vmov 0.0|0.0   ;;  %vm2631_vm1 = vmmov 0   ;;  %s2633_s24 = smov 96   ;;  %s3113_s1 = inlined_call_operand.vmem [shape: f32[104,128], index: 1, kind: input, shape index: {}]   ;;  %s3114_s0 = inlined_call_operand.vmem [shape: f32[128,8], index: 0, kind: input, shape index: {}]   ;;  %s3115_s2 = inlined_call_operand.vmem [shape: f32[3,128], index: 2, kind: input, shape index: {}]   ;;  %s3116_s4 = inlined_call_operand.vmem [shape: f32[8,32], index: 4, kind: output, shape index: {1}]   ;;  %s3117_s3 = inlined_call_operand.vmem [shape: f32[64,4], index: 3, kind: output, shape index: {0}]   ;;  %s3118_s5 = inlined_call_operand.vmem [shape: f32[8,32], index: 5, kind: output, shape index: {2}]  }
   0x1   :  { %v17_v0 = vld [vmem:[%s3113_s1] sm:$0xff]  ;;  %v32_v2 = vld [vmem:[%s3114_s0 + $0x8] sm:$0xff]  ;;  %v19_v19 = vld [vmem:[%s3113_s1 + $0x10] sm:$0xff]  ;;  %2370 = vmatprep.subr.bf16.mxu1 %v2630_v21  ;;  %v2632_v30 = vmov 0.0   ;;  %s2634_s30 = smov 32   ;;  %vm286_vm2 = vcmask 261120  }
   0x2   :  { %v31_v1 = vld [vmem:[%s3114_s0] sm:$0xff]  ;;  %2153 = vmatprep.subr.mxu0 %v17_v0  ;;  %v2676_v4 = vshrl.u32 %v241_v3, 7  ;;  %v18_v18 = vld [vmem:[%s3113_s1 + $0x8] sm:$0xff]  ;;  %v33_v20 = vld [vmem:[%s3114_s0 + $0x10] sm:$0xff]  ;;  %2198 = vmatprep.mubr.msk.f32.mxu1 %vm2631_vm1, %v2632_v30  ;;  %vm1965_vm3 = vcmask 31744  }
   0x3   :  { %2155 = vmatprep.mubr.msk.f32.mxu0 %vm47_vm0, %v31_v1  ;;  %2154 = vmatpush3.msra.mxu0 %v17_v0  ;;  %v2682_v6 = vld [vmem:[%s3115_s2] sm:$0x7]  ;;  %v2701_v22 = vpack.c.bf16 %v19_v19, %v18_v18  ;;  %v34_v23 = vld [vmem:[%s3114_s0 + $0x18] sm:$0xff]  ;;  %v36_v25 = vld [vmem:[%s3114_s0 + $0x28] sm:$0xff] }
   0x4   :  { %2156 = vmatmul.mubr.msk.f32.vlgmr.msra.gmra.mrb[0].mxu0 %vm47_vm0, %v32_v2  ;;  %v243_v5 = vsub.s32 0, %v2676_v4  ;;  %2364 = vmatprep.subr.bf16.mxu0 %v2630_v21  ;;  %v35_v24 = vld [vmem:[%s3114_s0 + $0x20] sm:$0xff]  ;;  %v20_v26 = vld [vmem:[%s3113_s1 + $0x18] sm:$0xff]  ;;  %v37_v28 = vld [vmem:[%s3114_s0 + $0x30] sm:$0xff]  ;;  %v255_v47 = vsub.s32 1, %v2676_v4 }
   0x5   :  { %2158 = vmatprep.mubr.msk.f32.mxu0 %vm47_vm0, %v33_v20  ;;  %2366 = vmatpush3.bf16.msra.mxu0 %v2701_v22  ;;  %v21_v27 = vld [vmem:[%s3113_s1 + $0x20] sm:$0xff]  ;;  %v38_v31 = vld [vmem:[%s3114_s0 + $0x38] sm:$0xff]  ;;  %v40_v34 = vld [vmem:[%s3114_s0 + $0x48] sm:$0xff] }
   0x6   :  { %v2685_v7 = vrot.slane %v2682_v6, %v243_v5  ;;  %2367 = vmatprep.subr.bf16.mxu0 %v2630_v21  ;;  %v2727_v29 = vpack.c.bf16 %v21_v27, %v20_v26  ;;  %2372 = vmatpush3.bf16.msra.mxu1 %v2701_v22  ;;  %v39_v32 = vld [vmem:[%s3114_s0 + $0x40] sm:$0xff]  ;;  %v41_v35 = vld [vmem:[%s3114_s0 + $0x50] sm:$0xff]  ;;  %v42_v36 = vld [vmem:[%s3114_s0 + $0x58] sm:$0xff]  ;;  %v2794_v50 = vrot.slane %v2682_v6, %v255_v47 }
   0x7   :  { %2373 = vmatprep.subr.bf16.mxu1 %v2630_v21  ;;  %v43_v37 = vld [vmem:[%s3114_s0 + $0x60] sm:$0xff]  ;;  %v44_v38 = vld [vmem:[%s3114_s0 + $0x68] sm:$0xff]  ;;  %v45_v39 = vld [vmem:[%s3114_s0 + $0x70] sm:$0xff] }
   0x8   :  { %2159 = vmatmul.mubr.msk.f32.gmra.mrb[2].mxu0 %vm47_vm0, %v34_v23  ;;  %v46_v40 = vld [vmem:[%s3114_s0 + $0x78] sm:$0xff] }
   0x9   :  { %2161 = vmatprep.mubr.msk.f32.mxu0 %vm47_vm0, %v35_v24  ;;  %2369 = vmatpush3.bf16.msra.mxu0 %v2727_v29 }
   0xa   :  { %2375 = vmatpush3.bf16.msra.mxu1 %v2727_v29  ;;  %2388 = vmatprep.subr.bf16.mxu0 %v2630_v21 }
   0xb   :  { %2376 = vmatprep.subr.bf16.mxu1 %v2630_v21 }
   0xc   :  { %2162 = vmatmul.mubr.msk.f32.gmra.mrb[4].mxu0 %vm47_vm0, %v36_v25 }
   0xd   :  { %2164 = vmatprep.mubr.msk.f32.mxu0 %vm47_vm0, %v37_v28 }
  0x10   :  { %2165 = vmatmul.mubr.msk.f32.gmra.mrb[6].mxu0 %vm47_vm0, %v38_v31 }
  0x11   :  { %2167 = vmatprep.mubr.msk.f32.mxu0 %vm47_vm0, %v39_v32 }
  0x14   :  { %2168 = vmatmul.mubr.msk.f32.gmra.mrb[8].mxu0 %vm47_vm0, %v40_v34 }
  0x15   :  { %2170 = vmatprep.mubr.msk.f32.mxu0 %vm47_vm0, %v41_v35 }
  0x18   :  { %2171 = vmatmul.mubr.msk.f32.gmra.mrb[10].mxu0 %vm47_vm0, %v42_v36 }
  0x19   :  { %2173 = vmatprep.mubr.msk.f32.mxu0 %vm47_vm0, %v43_v37 }
  0x1c   :  { %2174 = vmatmul.mubr.msk.f32.gmra.mrb[12].mxu0 %vm47_vm0, %v44_v38 }
  0x1d   :  { %2176 = vmatprep.mubr.msk.f32.mxu0 %vm47_vm0, %v45_v39 }
  0x20   :  { %2177 = vmatmul.mubr.msk.f32.gmra.mrb[14].mxu0 %vm47_vm0, %v46_v40 }
  0x21   :  { %2187 = vmatprep.mubr.msk.f32.mxu0 %vm2631_vm1, %v2632_v30 }
  0xd7   :  { %v2687_v8 = vpop.f32.mrb[0].mxu0 }
  0xd8   :  { %v162_v9 = vpop.f32.mrb[1].mxu0  ;;  %v246_v3 = vadd.f32 %v2687_v8, %v2685_v7 }
  0xd9   :  { %v245_v10 = vadd.f32 %v2685_v7, %v162_v9 }
  0xdb   :  { %2468 = vtanh.f32 %v245_v10  ;;  %v2002_v12 = vmul.f32 -1.442695, %v245_v10  ;;  %v2780_v43 = vpop.f32.mrb[2].mxu0 }
  0xdc   :  { %v2782_v44 = vpop.f32.mrb[3].mxu0 }
  0xdd   :  { %2470 = vpow2.f32 %v2002_v12  ;;  %v247_v26 = vadd.f32 %v2685_v7, %v2782_v44 }
  0xdf   :  { %v2784_v45 = vpop.f32.mrb[4].mxu0 }
  0xe0   :  { %v2786_v46 = vpop.f32.mrb[5].mxu0 }
  0xe3   :  { %v2789_v48 = vpop.f32.mrb[6].mxu0 }
  0xe4   :  { %v2791_v49 = vpop.f32.mrb[7].mxu0 }
  0xe5   :  { %v2469_v11 = vpop.eup %2468 }
  0xe6   :  { %273 = vrot.lane.b32.xlu0 %v2469_v11, %s2629_s26 }
  0xe7   :  { %v2471_v13 = vpop.eup %2470  ;;  %v2169_v51 = vpop.f32.mrb[8].mxu0 }
  0xe8   :  { %v268_v14 = vadd.f32 1.0, %v2471_v13  ;;  %v2797_v52 = vadd.f32 %v2169_v51, %v2794_v50  ;;  %v2799_v53 = vpop.f32.mrb[9].mxu0 }
  0xea   :  { %2472 = vrcp.f32 %v268_v14 }
  0xeb   :  { %v2172_v54 = vpop.f32.mrb[10].mxu0 }
  0xec   :  { %v2802_v55 = vadd.f32 %v2172_v54, %v2794_v50  ;;  %v212_v56 = vpop.f32.mrb[11].mxu0  ;;  %v248_v54 = vadd.f32 %v2780_v43, %v2685_v7 }
  0xed   :  { %v2805_v57 = vadd.f32 %v2794_v50, %v212_v56 }
  0xef   :  { %v2175_v58 = vpop.f32.mrb[12].mxu0 }
  0xf0   :  { %v2808_v59 = vadd.f32 %v2175_v58, %v2794_v50  ;;  %v222_v60 = vpop.f32.mrb[13].mxu0 }
  0xf1   :  { %v2811_v61 = vadd.f32 %v2794_v50, %v222_v60 }
  0xf3   :  { %v2178_v62 = vpop.f32.mrb[14].mxu0 }
  0xf4   :  { %v2473_v15 = vpop.eup %2472  ;;  %v2814_v63 = vadd.f32 %v2178_v62, %v2794_v50  ;;  %v232_v0 = vpop.f32.mrb[15].mxu0 }
  0xf5   :  { %v2817_v1 = vadd.f32 %v2794_v50, %v232_v0 }
 0x158   :  { %v274_v16 = vpop.permute.xlu0 %273 }
 0x159   :  { %v276_v17 = vmul.f32 %v2473_v15, %v274_v16 }
 0x15b   :  { %2474 = vtanh.f32 %v276_v17 }
 0x165   :  { %v2475_v33 = vpop.eup %2474 }
 0x166   :  { %279 = vrot.lane.b32.xlu0 %v2475_v33, %s2633_s24 }
 0x16a   :  { %368 = vrot.lane.b32.xlu0 %v276_v17, %s2634_s30 }
 0x1d8   :  { %v280_v41 = vpop.permute.xlu0 %279 }
 0x1d9   :  { %v282_v42 = vmul.f32 %v2473_v15, %v280_v41 }
 0x1db   :  { %284 = vrot.lane.b32.xlu1 %v282_v42, %s2634_s30 }
 0x1dc   :  { %v369_v17 = vpop.permute.xlu0 %368 }
 0x24d   :  { %v285_v2 = vpop.permute.xlu1 %284 }
 0x24e   :  { %2188 = vmatmul.mubr.msk.f32.vlgmr.msra.gmra.mrb[16].mxu0 %vm286_vm2, %v285_v2 }
 0x24f   :  { %2390 = vmatpush3.bf16.msra.mxu0 %v2701_v22  ;;  %2231 = vmatprep.mubr.msk.f32.mxu0 %vm2631_vm1, %v2632_v30 }
 0x250   :  { %2391 = vmatprep.subr.bf16.mxu0 %v2630_v21 }
 0x253   :  { %2393 = vmatpush3.bf16.msra.mxu0 %v2727_v29 }
 0x254   :  { %2400 = vmatprep.subr.bf16.mxu0 %v2630_v21 }
 0x321   :  { %v355_v5 = vpop.f32.mrb[16].mxu0 }
 0x322   :  { %v359_v6 = vadd.f32 %v355_v5, %v246_v3  ;;  %v2189_v9 = vpop.f32.mrb[17].mxu0 }
 0x324   :  { %2476 = vtanh.f32 %v359_v6  ;;  %v2004_v11 = vmul.f32 -1.442695, %v359_v6 }
 0x326   :  { %2478 = vpow2.f32 %v2004_v11 }
 0x32e   :  { %v2477_v10 = vpop.eup %2476 }
 0x32f   :  { %373 = vrot.lane.b32.xlu1 %v2477_v10, %s2629_s26 }
 0x330   :  { %v2479_v12 = vpop.eup %2478 }
 0x331   :  { %v363_v13 = vadd.f32 1.0, %v2479_v12 }
 0x333   :  { %2480 = vrcp.f32 %v363_v13 }
 0x33d   :  { %v2481_v14 = vpop.eup %2480 }
 0x33e   :  { %v371_v18 = vmul.f32 %v2481_v14, %v369_v17 }
 0x3a1   :  { %v374_v15 = vpop.permute.xlu1 %373 }
 0x3a2   :  { %v376_v16 = vmul.f32 %v2481_v14, %v374_v15 }
 0x3a4   :  { %378 = vrot.lane.b32.xlu1 %v376_v16, %s2634_s30  ;;  %v249_v16 = vadd.f32 %v2685_v7, %v2786_v46 }
 0x416   :  { %v379_v8 = vpop.permute.xlu1 %378 }
 0x417   :  { %v381_v19 = vadd.f32 %v379_v8, %v371_v18 }
 0x419   :  { %2482 = vtanh.f32 %v381_v19 }
 0x423   :  { %v2483_v20 = vpop.eup %2482 }
 0x424   :  { %384 = vrot.lane.b32.xlu0 %v2483_v20, %s2629_s26 }
 0x496   :  { %v385_v23 = vpop.permute.xlu0 %384 }
 0x497   :  { %v387_v24 = vmul.f32 %v2481_v14, %v385_v23 }
 0x499   :  { %389 = vrot.lane.b32.xlu1 %v387_v24, %s2634_s30 }
 0x50b   :  { %v390_v25 = vpop.permute.xlu1 %389 }
 0x50c   :  { %2199 = vmatmul.mubr.msk.f32.vlgmr.msra.gmra.mrb[0].mxu1 %vm286_vm2, %v390_v25 }
 0x50d   :  { %2378 = vmatpush3.bf16.msra.mxu1 %v2701_v22  ;;  %2209 = vmatprep.mubr.msk.f32.mxu1 %vm2631_vm1, %v2632_v30 }
 0x50e   :  { %2379 = vmatprep.subr.bf16.mxu1 %v2630_v21 }
 0x511   :  { %2381 = vmatpush3.bf16.msra.mxu1 %v2727_v29 }
 0x512   :  { %2382 = vmatprep.subr.bf16.mxu1 %v2630_v21 }
 0x5df   :  { %v459_v27 = vpop.f32.mrb[0].mxu1 }
 0x5e0   :  { %v463_v28 = vadd.f32 %v459_v27, %v247_v26  ;;  %v2200_v31 = vpop.f32.mrb[1].mxu1 }
 0x5e2   :  { %2484 = vtanh.f32 %v463_v28  ;;  %v2006_v33 = vmul.f32 -1.442695, %v463_v28 }
 0x5e4   :  { %2486 = vpow2.f32 %v2006_v33 }
 0x5ec   :  { %v2485_v32 = vpop.eup %2484 }
 0x5ed   :  { %473 = vrot.lane.b32.xlu0 %v2485_v32, %s2629_s26 }
 0x5ee   :  { %v2487_v34 = vpop.eup %2486 }
 0x5ef   :  { %v467_v35 = vadd.f32 1.0, %v2487_v34 }
 0x5f1   :  { %2488 = vrcp.f32 %v467_v35 }
 0x5fb   :  { %v2489_v36 = vpop.eup %2488 }
 0x5fc   :  { %v471_v39 = vmul.f32 %v2489_v36, %v381_v19 }
 0x65f   :  { %v474_v37 = vpop.permute.xlu0 %473 }
 0x660   :  { %v476_v38 = vmul.f32 %v2489_v36, %v474_v37 }
 0x662   :  { %478 = vrot.lane.b32.xlu1 %v476_v38, %s2634_s30 }
 0x6d4   :  { %v479_v40 = vpop.permute.xlu1 %478 }
 0x6d5   :  { %v481_v41 = vadd.f32 %v479_v40, %v471_v39 }
 0x6d7   :  { %2490 = vtanh.f32 %v481_v41 }
 0x6e1   :  { %v2491_v42 = vpop.eup %2490 }
 0x6e2   :  { %484 = vrot.lane.b32.xlu0 %v2491_v42, %s2629_s26 }
 0x754   :  { %v485_v44 = vpop.permute.xlu0 %484 }
 0x755   :  { %v487_v47 = vmul.f32 %v2489_v36, %v485_v44  ;;  %v250_v36 = vadd.f32 %v2784_v45, %v2685_v7 }
 0x757   :  { %489 = vrot.lane.b32.xlu1 %v487_v47, %s2634_s30 }
 0x7c9   :  { %v490_v51 = vpop.permute.xlu1 %489 }
 0x7ca   :  { %2210 = vmatmul.mubr.msk.f32.vlgmr.msra.gmra.mrb[2].mxu1 %vm286_vm2, %v490_v51 }
 0x7cb   :  { %2384 = vmatpush3.bf16.msra.mxu1 %v2701_v22  ;;  %2220 = vmatprep.mubr.msk.f32.mxu1 %vm2631_vm1, %v2632_v30 }
 0x7cc   :  { %2385 = vmatprep.subr.bf16.mxu1 %v2630_v21 }
 0x7cf   :  { %2387 = vmatpush3.bf16.msra.mxu1 %v2727_v29 }
 0x7d0   :  { %2394 = vmatprep.subr.bf16.mxu1 %v2630_v21 }
 0x89d   :  { %v559_v56 = vpop.f32.mrb[2].mxu1 }
 0x89e   :  { %v563_v58 = vadd.f32 %v559_v56, %v248_v54  ;;  %v2211_v60 = vpop.f32.mrb[3].mxu1 }
 0x8a0   :  { %2492 = vtanh.f32 %v563_v58  ;;  %v2008_v0 = vmul.f32 -1.442695, %v563_v58 }
 0x8a2   :  { %2494 = vpow2.f32 %v2008_v0  ;;  %v251_v0 = vadd.f32 %v2685_v7, %v2791_v49 }
 0x8aa   :  { %v2493_v62 = vpop.eup %2492 }
 0x8ab   :  { %573 = vrot.lane.b32.xlu0 %v2493_v62, %s2629_s26 }
 0x8ac   :  { %v2495_v2 = vpop.eup %2494 }
 0x8ad   :  { %v567_v3 = vadd.f32 1.0, %v2495_v2 }
 0x8af   :  { %2496 = vrcp.f32 %v567_v3 }
 0x8b9   :  { %v2497_v5 = vpop.eup %2496 }
 0x8ba   :  { %v571_v10 = vmul.f32 %v2497_v5, %v481_v41 }
 0x91d   :  { %v574_v6 = vpop.permute.xlu0 %573 }
 0x91e   :  { %v576_v9 = vmul.f32 %v2497_v5, %v574_v6 }
 0x920   :  { %578 = vrot.lane.b32.xlu1 %v576_v9, %s2634_s30 }
 0x992   :  { %v579_v11 = vpop.permute.xlu1 %578 }
 0x993   :  { %v581_v43 = vadd.f32 %v579_v11, %v571_v10 }
 0x995   :  { %2498 = vtanh.f32 %v581_v43 }
 0x99f   :  { %v2499_v12 = vpop.eup %2498 }
 0x9a0   :  { %584 = vrot.lane.b32.xlu0 %v2499_v12, %s2629_s26 }
 0xa12   :  { %v585_v13 = vpop.permute.xlu0 %584 }
 0xa13   :  { %v587_v14 = vmul.f32 %v2497_v5, %v585_v13 }
 0xa15   :  { %589 = vrot.lane.b32.xlu1 %v587_v14, %s2634_s30 }
 0xa87   :  { %v590_v15 = vpop.permute.xlu1 %589 }
 0xa88   :  { %2221 = vmatmul.mubr.msk.f32.vlgmr.msra.gmra.mrb[4].mxu1 %vm286_vm2, %v590_v15 }
 0xa89   :  { %2396 = vmatpush3.bf16.msra.mxu1 %v2701_v22  ;;  %2242 = vmatprep.mubr.msk.f32.mxu1 %vm2631_vm1, %v2632_v30 }
 0xa8a   :  { %2397 = vmatprep.subr.bf16.mxu1 %v2630_v21 }
 0xa8d   :  { %2399 = vmatpush3.bf16.msra.mxu1 %v2727_v29 }
 0xa8e   :  { %2406 = vmatprep.subr.bf16.mxu1 %v2630_v21 }
 0xb5b   :  { %v659_v17 = vpop.f32.mrb[4].mxu1 }
 0xb5c   :  { %v663_v18 = vadd.f32 %v659_v17, %v249_v16  ;;  %v2222_v8 = vpop.f32.mrb[5].mxu1 }
 0xb5e   :  { %2500 = vtanh.f32 %v663_v18  ;;  %v2010_v20 = vmul.f32 -1.442695, %v663_v18 }
 0xb60   :  { %2502 = vpow2.f32 %v2010_v20 }
 0xb68   :  { %v2501_v19 = vpop.eup %2500 }
 0xb69   :  { %673 = vrot.lane.b32.xlu0 %v2501_v19, %s2629_s26  ;;  %v252_v19 = vadd.f32 %v2789_v48, %v2685_v7  ;;  %v22_v48 = vld [vmem:[%s3113_s1 + $0x28] sm:$0xff] }
 0xb6a   :  { %v2503_v23 = vpop.eup %2502 }
 0xb6b   :  { %v667_v24 = vadd.f32 1.0, %v2503_v23 }
 0xb6d   :  { %2504 = vrcp.f32 %v667_v24 }
 0xb77   :  { %v2505_v25 = vpop.eup %2504 }
 0xb78   :  { %v671_v28 = vmul.f32 %v2505_v25, %v581_v43 }
 0xbdb   :  { %v674_v26 = vpop.permute.xlu0 %673 }
 0xbdc   :  { %v676_v27 = vmul.f32 %v2505_v25, %v674_v26 }
 0xbde   :  { %678 = vrot.lane.b32.xlu1 %v676_v27, %s2634_s30 }
 0xc50   :  { %v679_v31 = vpop.permute.xlu1 %678 }
 0xc51   :  { %v681_v46 = vadd.f32 %v679_v31, %v671_v28 }
 0xc53   :  { %2506 = vtanh.f32 %v681_v46 }
 0xc5d   :  { %v2507_v32 = vpop.eup %2506 }
 0xc5e   :  { %684 = vrot.lane.b32.xlu0 %v2507_v32, %s2629_s26 }
 0xcd0   :  { %v685_v33 = vpop.permute.xlu0 %684 }
 0xcd1   :  { %v687_v34 = vmul.f32 %v2505_v25, %v685_v33 }
 0xcd3   :  { %689 = vrot.lane.b32.xlu1 %v687_v34, %s2634_s30 }
 0xd45   :  { %v690_v35 = vpop.permute.xlu1 %689 }
 0xd46   :  { %2232 = vmatmul.mubr.msk.f32.vlgmr.msra.gmra.mrb[18].mxu0 %vm286_vm2, %v690_v35  ;;  %v23_v35 = vld [vmem:[%s3113_s1 + $0x30] sm:$0xff] }
 0xd47   :  { %2402 = vmatpush3.bf16.msra.mxu0 %v2701_v22  ;;  %2253 = vmatprep.mubr.msk.f32.mxu0 %vm2631_vm1, %v2632_v30 }
 0xd48   :  { %2403 = vmatprep.subr.bf16.mxu0 %v2630_v21 }
 0xd4b   :  { %2405 = vmatpush3.bf16.msra.mxu0 %v2727_v29 }
 0xd4c   :  { %2412 = vmatprep.subr.bf16.mxu0 %v2630_v21 }
 0xe19   :  { %v759_v37 = vpop.f32.mrb[18].mxu0 }
 0xe1a   :  { %v763_v38 = vadd.f32 %v759_v37, %v250_v36  ;;  %v2233_v39 = vpop.f32.mrb[19].mxu0  ;;  %v24_v36 = vld [vmem:[%s3113_s1 + $0x38] sm:$0xff]  ;;  %v2912_v37 = vpack.c.bf16 %v23_v35, %v22_v48 }
 0xe1c   :  { %2508 = vtanh.f32 %v763_v38  ;;  %v2012_v22 = vmul.f32 -1.442695, %v763_v38  ;;  %v25_v38 = vld [vmem:[%s3113_s1 + $0x40] sm:$0xff] }
 0xe1d   :  { %v2918_v39 = vpack.c.bf16 %v25_v38, %v24_v36 }
 0xe1e   :  { %2510 = vpow2.f32 %v2012_v22 }
 0xe26   :  { %v2509_v40 = vpop.eup %2508 }
 0xe27   :  { %773 = vrot.lane.b32.xlu0 %v2509_v40, %s2629_s26 }
 0xe28   :  { %v2511_v41 = vpop.eup %2510 }
 0xe29   :  { %v767_v42 = vadd.f32 1.0, %v2511_v41 }
 0xe2b   :  { %2512 = vrcp.f32 %v767_v42 }
 0xe35   :  { %v2513_v44 = vpop.eup %2512 }
 0xe36   :  { %v771_v51 = vmul.f32 %v2513_v44, %v681_v46 }
 0xe99   :  { %v774_v47 = vpop.permute.xlu0 %773 }
 0xe9a   :  { %v776_v29 = vmul.f32 %v2513_v44, %v774_v47 }
 0xe9c   :  { %778 = vrot.lane.b32.xlu1 %v776_v29, %s2634_s30 }
 0xf0e   :  { %v779_v54 = vpop.permute.xlu1 %778 }
 0xf0f   :  { %v781_v45 = vadd.f32 %v779_v54, %v771_v51 }
 0xf11   :  { %2514 = vtanh.f32 %v781_v45 }
 0xf1b   :  { %v2515_v56 = vpop.eup %2514 }
 0xf1c   :  { %784 = vrot.lane.b32.xlu0 %v2515_v56, %s2629_s26 }
 0xf8e   :  { %v785_v58 = vpop.permute.xlu0 %784 }
 0xf8f   :  { %v787_v60 = vmul.f32 %v2513_v44, %v785_v58  ;;  %v257_v44 = vadd.f32 %v2794_v50, %v2799_v53 }
 0xf91   :  { %789 = vrot.lane.b32.xlu1 %v787_v60, %s2634_s30 }
0x1003   :  { %v790_v62 = vpop.permute.xlu1 %789 }
0x1004   :  { %2243 = vmatmul.mubr.msk.f32.vlgmr.msra.gmra.mrb[6].mxu1 %vm286_vm2, %v790_v62 }
0x1005   :  { %2264 = vmatprep.mubr.msk.f32.mxu1 %vm2631_vm1, %v2632_v30  ;;  %2408 = vmatpush3.bf16.msra.mxu1 %v2912_v37 }
0x1006   :  { %2409 = vmatprep.subr.bf16.mxu1 %v2630_v21 }
0x1009   :  { %2411 = vmatpush3.bf16.msra.mxu1 %v2918_v39 }
0x100a   :  { %2418 = vmatprep.subr.bf16.mxu1 %v2630_v21 }
0x10d7   :  { %v859_v2 = vpop.f32.mrb[6].mxu1 }
0x10d8   :  { %v863_v3 = vadd.f32 %v859_v2, %v251_v0  ;;  %v2244_v5 = vpop.f32.mrb[7].mxu1 }
0x10da   :  { %2516 = vtanh.f32 %v863_v3  ;;  %v2014_v9 = vmul.f32 -1.442695, %v863_v3 }
0x10dc   :  { %2518 = vpow2.f32 %v2014_v9 }
0x10e4   :  { %v2517_v6 = vpop.eup %2516 }
0x10e5   :  { %873 = vrot.lane.b32.xlu0 %v2517_v6, %s2629_s26 }
0x10e6   :  { %v2519_v10 = vpop.eup %2518 }
0x10e7   :  { %v867_v11 = vadd.f32 1.0, %v2519_v10 }
0x10e9   :  { %2520 = vrcp.f32 %v867_v11 }
0x10f3   :  { %v2521_v43 = vpop.eup %2520 }
0x10f4   :  { %v871_v14 = vmul.f32 %v2521_v43, %v781_v45 }
0x1157   :  { %v874_v12 = vpop.permute.xlu0 %873 }
0x1158   :  { %v876_v13 = vmul.f32 %v2521_v43, %v874_v12 }
0x115a   :  { %878 = vrot.lane.b32.xlu1 %v876_v13, %s2634_s30 }
0x11cc   :  { %v879_v15 = vpop.permute.xlu1 %878 }
0x11cd   :  { %v881_v49 = vadd.f32 %v879_v15, %v871_v14 }
0x11cf   :  { %2522 = vtanh.f32 %v881_v49 }
0x11d9   :  { %v2523_v16 = vpop.eup %2522 }
0x11da   :  { %884 = vrot.lane.b32.xlu0 %v2523_v16, %s2629_s26 }
0x124c   :  { %v885_v17 = vpop.permute.xlu0 %884 }
0x124d   :  { %v887_v18 = vmul.f32 %v2521_v43, %v885_v17 }
0x124f   :  { %889 = vrot.lane.b32.xlu1 %v887_v18, %s2634_s30 }
0x12c1   :  { %v890_v8 = vpop.permute.xlu1 %889 }
0x12c2   :  { %2254 = vmatmul.mubr.msk.f32.vlgmr.msra.gmra.mrb[20].mxu0 %vm286_vm2, %v890_v8 }
0x12c3   :  { %2275 = vmatprep.mubr.msk.f32.mxu0 %vm2631_vm1, %v2632_v30  ;;  %2414 = vmatpush3.bf16.msra.mxu0 %v2912_v37 }
0x12c4   :  { %2415 = vmatprep.subr.bf16.mxu0 %v2630_v21 }
0x12c7   :  { %2417 = vmatpush3.bf16.msra.mxu0 %v2918_v39 }
0x12c8   :  { %2424 = vmatprep.subr.bf16.mxu0 %v2630_v21 }
0x1395   :  { %v959_v20 = vpop.f32.mrb[20].mxu0 }
0x1396   :  { %v963_v23 = vadd.f32 %v959_v20, %v252_v19  ;;  %v2255_v24 = vpop.f32.mrb[21].mxu0 }
0x1398   :  { %2524 = vtanh.f32 %v963_v23  ;;  %v2016_v26 = vmul.f32 -1.442695, %v963_v23 }
0x139a   :  { %2526 = vpow2.f32 %v2016_v26 }
0x13a2   :  { %v2525_v25 = vpop.eup %2524 }
0x13a3   :  { %973 = vrot.lane.b32.xlu0 %v2525_v25, %s2629_s26 }
0x13a4   :  { %v2527_v27 = vpop.eup %2526 }
0x13a5   :  { %v967_v28 = vadd.f32 1.0, %v2527_v27 }
0x13a7   :  { %2528 = vrcp.f32 %v967_v28 }
0x13b1   :  { %v2529_v31 = vpop.eup %2528 }
0x13b2   :  { %v971_v33 = vmul.f32 %v2529_v31, %v881_v49 }
0x1415   :  { %v974_v46 = vpop.permute.xlu0 %973 }
0x1416   :  { %v976_v32 = vmul.f32 %v2529_v31, %v974_v46 }
0x1418   :  { %978 = vrot.lane.b32.xlu1 %v976_v32, %s2634_s30 }
0x148a   :  { %v979_v34 = vpop.permute.xlu1 %978 }
0x148b   :  { %v2900_v7 = vadd.f32 %v979_v34, %v971_v33 }
0x148d   :  { %2530 = vtanh.f32 %v2900_v7 }
0x1497   :  { %v2531_v40 = vpop.eup %2530 }
0x1498   :  { %984 = vrot.lane.b32.xlu0 %v2531_v40, %s2629_s26 }
0x150a   :  { %v985_v22 = vpop.permute.xlu0 %984 }
0x150b   :  { %v987_v41 = vmul.f32 %v2529_v31, %v985_v22 }
0x150d   :  { %989 = vrot.lane.b32.xlu1 %v987_v41, %s2634_s30 }
0x157f   :  { %v990_v42 = vpop.permute.xlu1 %989 }
0x1580   :  { %992 = vst.msk [vmem:[%s3116_s4] sm:$0xff] %vm286_vm2, %v990_v42  ;;  %2265 = vmatmul.mubr.msk.f32.vlgmr.msra.gmra.mrb[8].mxu1 %vm286_vm2, %v990_v42 }
0x1581   :  { %2420 = vmatpush3.bf16.msra.mxu1 %v2912_v37  ;;  %2286 = vmatprep.mubr.msk.f32.mxu1 %vm2631_vm1, %v2632_v30 }
0x1582   :  { %2421 = vmatprep.subr.bf16.mxu1 %v2630_v21 }
0x1585   :  { %2423 = vmatpush3.bf16.msra.mxu1 %v2918_v39 }
0x1586   :  { %2430 = vmatprep.subr.bf16.mxu1 %v2630_v21 }
0x1653   :  { %v1066_v47 = vpop.f32.mrb[8].mxu1 }
0x1654   :  { %v1070_v29 = vadd.f32 %v1066_v47, %v257_v44  ;;  %v2266_v51 = vpop.f32.mrb[9].mxu1 }
0x1656   :  { %2532 = vtanh.f32 %v1070_v29  ;;  %v2018_v45 = vmul.f32 -1.442695, %v1070_v29 }
0x1658   :  { %2534 = vpow2.f32 %v2018_v45 }
0x1660   :  { %v2533_v54 = vpop.eup %2532 }
0x1661   :  { %1080 = vrot.lane.b32.xlu0 %v2533_v54, %s2629_s26 }
0x1662   :  { %v2535_v56 = vpop.eup %2534 }
0x1663   :  { %v1074_v58 = vadd.f32 1.0, %v2535_v56 }
0x1665   :  { %2536 = vrcp.f32 %v1074_v58 }
0x166f   :  { %v2537_v60 = vpop.eup %2536 }
0x1670   :  { %v1078_v2 = vmul.f32 %v2537_v60, %v2900_v7 }
0x16d3   :  { %v1081_v62 = vpop.permute.xlu0 %1080 }
0x16d4   :  { %v1083_v0 = vmul.f32 %v2537_v60, %v1081_v62 }
0x16d6   :  { %1085 = vrot.lane.b32.xlu1 %v1083_v0, %s2634_s30 }
0x1748   :  { %v1086_v50 = vpop.permute.xlu1 %1085 }
0x1749   :  { %v1088_v53 = vadd.f32 %v1086_v50, %v1078_v2 }
0x174b   :  { %2538 = vtanh.f32 %v1088_v53 }
0x1755   :  { %v2539_v3 = vpop.eup %2538 }
0x1756   :  { %1091 = vrot.lane.b32.xlu0 %v2539_v3, %s2629_s26 }
0x17c8   :  { %v1092_v5 = vpop.permute.xlu0 %1091 }
0x17c9   :  { %v1094_v6 = vmul.f32 %v2537_v60, %v1092_v5 }
0x17cb   :  { %1096 = vrot.lane.b32.xlu1 %v1094_v6, %s2634_s30 }
0x183d   :  { %v2947_v9 = vpop.permute.xlu1 %1096 }
0x183e   :  { %2276 = vmatmul.mubr.msk.f32.vlgmr.msra.gmra.mrb[22].mxu0 %vm286_vm2, %v2947_v9 }
0x183f   :  { %2426 = vmatpush3.bf16.msra.mxu0 %v2912_v37  ;;  %2297 = vmatprep.mubr.msk.f32.mxu0 %vm2631_vm1, %v2632_v30 }
0x1840   :  { %2427 = vmatprep.subr.bf16.mxu0 %v2630_v21 }
0x1843   :  { %2429 = vmatpush3.bf16.msra.mxu0 %v2918_v39 }
0x1844   :  { %2436 = vmatprep.subr.bf16.mxu0 %v2630_v21 }
0x1911   :  { %v1166_v10 = vpop.f32.mrb[22].mxu0 }
0x1912   :  { %v1170_v11 = vadd.f32 %v1166_v10, %v2797_v52  ;;  %v2277_v43 = vpop.f32.mrb[23].mxu0 }
0x1914   :  { %2540 = vtanh.f32 %v1170_v11  ;;  %v2020_v13 = vmul.f32 -1.442695, %v1170_v11 }
0x1916   :  { %2542 = vpow2.f32 %v2020_v13 }
0x191e   :  { %v2541_v12 = vpop.eup %2540 }
0x191f   :  { %1180 = vrot.lane.b32.xlu0 %v2541_v12, %s2629_s26 }
0x1920   :  { %v2543_v14 = vpop.eup %2542 }
0x1921   :  { %v1174_v15 = vadd.f32 1.0, %v2543_v14 }
0x1923   :  { %2544 = vrcp.f32 %v1174_v15 }
0x192d   :  { %v2545_v49 = vpop.eup %2544 }
0x192e   :  { %v1178_v18 = vmul.f32 %v2545_v49, %v1088_v53 }
0x1991   :  { %v1181_v16 = vpop.permute.xlu0 %1180 }
0x1992   :  { %v1183_v17 = vmul.f32 %v2545_v49, %v1181_v16 }
0x1994   :  { %1185 = vrot.lane.b32.xlu1 %v1183_v17, %s2634_s30 }
0x1a06   :  { %v1186_v8 = vpop.permute.xlu1 %1185 }
0x1a07   :  { %v1188_v19 = vadd.f32 %v1186_v8, %v1178_v18 }
0x1a09   :  { %2546 = vtanh.f32 %v1188_v19 }
0x1a13   :  { %v2547_v52 = vpop.eup %2546 }
0x1a14   :  { %1191 = vrot.lane.b32.xlu0 %v2547_v52, %s2629_s26 }
0x1a86   :  { %v1192_v20 = vpop.permute.xlu0 %1191 }
0x1a87   :  { %v1194_v23 = vmul.f32 %v2545_v49, %v1192_v20 }
0x1a89   :  { %1196 = vrot.lane.b32.xlu1 %v1194_v23, %s2634_s30 }
0x1afb   :  { %v2962_v24 = vpop.permute.xlu1 %1196 }
0x1afc   :  { %2287 = vmatmul.mubr.msk.f32.vlgmr.msra.gmra.mrb[10].mxu1 %vm286_vm2, %v2962_v24 }
0x1afd   :  { %2432 = vmatpush3.bf16.msra.mxu1 %v2912_v37  ;;  %2308 = vmatprep.mubr.msk.f32.mxu1 %vm2631_vm1, %v2632_v30 }
0x1afe   :  { %2433 = vmatprep.subr.bf16.mxu1 %v2630_v21 }
0x1b01   :  { %2435 = vmatpush3.bf16.msra.mxu1 %v2918_v39 }
0x1b02   :  { %2442 = vmatprep.subr.bf16.mxu1 %v2630_v21 }
0x1bcf   :  { %v1266_v25 = vpop.f32.mrb[10].mxu1 }
0x1bd0   :  { %v1270_v26 = vadd.f32 %v1266_v25, %v2805_v57  ;;  %v2288_v27 = vpop.f32.mrb[11].mxu1 }
0x1bd2   :  { %2548 = vtanh.f32 %v1270_v26  ;;  %v2022_v31 = vmul.f32 -1.442695, %v1270_v26 }
0x1bd4   :  { %2550 = vpow2.f32 %v2022_v31 }
0x1bdc   :  { %v2549_v28 = vpop.eup %2548 }
0x1bdd   :  { %1280 = vrot.lane.b32.xlu0 %v2549_v28, %s2629_s26 }
0x1bde   :  { %v2551_v46 = vpop.eup %2550 }
0x1bdf   :  { %v1274_v32 = vadd.f32 1.0, %v2551_v46 }
0x1be1   :  { %2552 = vrcp.f32 %v1274_v32 }
0x1beb   :  { %v2553_v33 = vpop.eup %2552 }
0x1bec   :  { %v1278_v35 = vmul.f32 %v2553_v33, %v1188_v19 }
0x1c4f   :  { %v1281_v34 = vpop.permute.xlu0 %1280 }
0x1c50   :  { %v1283_v48 = vmul.f32 %v2553_v33, %v1281_v34 }
0x1c52   :  { %1285 = vrot.lane.b32.xlu1 %v1283_v48, %s2634_s30 }
0x1cc4   :  { %v1286_v36 = vpop.permute.xlu1 %1285 }
0x1cc5   :  { %v1288_v38 = vadd.f32 %v1286_v36, %v1278_v35 }
0x1cc7   :  { %2554 = vtanh.f32 %v1288_v38 }
0x1cd1   :  { %v2555_v57 = vpop.eup %2554 }
0x1cd2   :  { %1291 = vrot.lane.b32.xlu0 %v2555_v57, %s2629_s26  ;;  %v29_v57 = vld [vmem:[%s3113_s1 + $0x60] sm:$0xff] }
0x1d44   :  { %v1292_v40 = vpop.permute.xlu0 %1291 }
0x1d45   :  { %v1294_v22 = vmul.f32 %v2553_v33, %v1292_v40  ;;  %v27_v33 = vld [vmem:[%s3113_s1 + $0x50] sm:$0xff] }
0x1d47   :  { %1296 = vrot.lane.b32.xlu1 %v1294_v22, %s2634_s30 }
0x1db9   :  { %v2977_v41 = vpop.permute.xlu1 %1296 }
0x1dba   :  { %2298 = vmatmul.mubr.msk.f32.vlgmr.msra.gmra.mrb[24].mxu0 %vm286_vm2, %v2977_v41 }
0x1dbb   :  { %2438 = vmatpush3.bf16.msra.mxu0 %v2912_v37  ;;  %2319 = vmatprep.mubr.msk.f32.mxu0 %vm2631_vm1, %v2632_v30 }
0x1dbc   :  { %2439 = vmatprep.subr.bf16.mxu0 %v2630_v21 }
0x1dbf   :  { %2441 = vmatpush3.bf16.msra.mxu0 %v2918_v39 }
0x1dc0   :  { %2448 = vmatprep.subr.bf16.mxu0 %v2630_v21 }
0x1e8d   :  { %v1366_v42 = vpop.f32.mrb[24].mxu0 }
0x1e8e   :  { %v1370_v44 = vadd.f32 %v1366_v42, %v2802_v55  ;;  %v2299_v47 = vpop.f32.mrb[25].mxu0 }
0x1e8f   :  { %v1907_v47 = vsub.s32 2, %v2676_v4 }
0x1e90   :  { %2556 = vtanh.f32 %v1370_v44  ;;  %v2024_v51 = vmul.f32 -1.442695, %v1370_v44 }
0x1e92   :  { %2558 = vpow2.f32 %v2024_v51 }
0x1e9a   :  { %v2557_v29 = vpop.eup %2556 }
0x1e9b   :  { %1380 = vrot.lane.b32.xlu0 %v2557_v29, %s2629_s26 }
0x1e9c   :  { %v2559_v54 = vpop.eup %2558 }
0x1e9d   :  { %v1374_v45 = vadd.f32 1.0, %v2559_v54 }
0x1e9f   :  { %2560 = vrcp.f32 %v1374_v45 }
0x1ea9   :  { %v2561_v56 = vpop.eup %2560 }
0x1eaa   :  { %v1378_v62 = vmul.f32 %v2561_v56, %v1288_v38  ;;  %v28_v38 = vld [vmem:[%s3113_s1 + $0x58] sm:$0xff] }
0x1eab   :  { %v2458_v40 = vpack.c.bf16 %v29_v57, %v28_v38 }
0x1f0d   :  { %v1381_v58 = vpop.permute.xlu0 %1380 }
0x1f0e   :  { %v1383_v60 = vmul.f32 %v2561_v56, %v1381_v58 }
0x1f10   :  { %1385 = vrot.lane.b32.xlu1 %v1383_v60, %s2634_s30 }
0x1f82   :  { %v1386_v0 = vpop.permute.xlu1 %1385 }
0x1f83   :  { %v1388_v2 = vadd.f32 %v1386_v0, %v1378_v62 }
0x1f85   :  { %2562 = vtanh.f32 %v1388_v2 }
0x1f8f   :  { %v2563_v55 = vpop.eup %2562 }
0x1f90   :  { %1391 = vrot.lane.b32.xlu0 %v2563_v55, %s2629_s26 }
0x2002   :  { %v1392_v50 = vpop.permute.xlu0 %1391 }
0x2003   :  { %v1394_v53 = vmul.f32 %v2561_v56, %v1392_v50 }
0x2005   :  { %1396 = vrot.lane.b32.xlu1 %v1394_v53, %s2634_s30 }
0x2077   :  { %v2992_v3 = vpop.permute.xlu1 %1396 }
0x2078   :  { %2309 = vmatmul.mubr.msk.f32.vlgmr.msra.gmra.mrb[12].mxu1 %vm286_vm2, %v2992_v3 }
0x2079   :  { %2444 = vmatpush3.bf16.msra.mxu1 %v2912_v37  ;;  %2330 = vmatprep.mubr.msk.f32.mxu1 %vm2631_vm1, %v2632_v30 }
0x207a   :  { %2445 = vmatprep.subr.bf16.mxu1 %v2630_v21 }
0x207d   :  { %2447 = vmatpush3.bf16.msra.mxu1 %v2918_v39 }
0x214b   :  { %v1466_v5 = vpop.f32.mrb[12].mxu1 }
0x214c   :  { %v1470_v6 = vadd.f32 %v1466_v5, %v2811_v61  ;;  %v2310_v10 = vpop.f32.mrb[13].mxu1 }
0x214e   :  { %2564 = vtanh.f32 %v1470_v6  ;;  %v2026_v43 = vmul.f32 -1.442695, %v1470_v6 }
0x2150   :  { %2566 = vpow2.f32 %v2026_v43 }
0x2158   :  { %v2565_v11 = vpop.eup %2564 }
0x2159   :  { %1480 = vrot.lane.b32.xlu0 %v2565_v11, %s2629_s26 }
0x215a   :  { %v2567_v12 = vpop.eup %2566 }
0x215b   :  { %v1474_v13 = vadd.f32 1.0, %v2567_v12 }
0x215d   :  { %2568 = vrcp.f32 %v1474_v13 }
0x2167   :  { %v2569_v14 = vpop.eup %2568 }
0x2168   :  { %v1478_v16 = vmul.f32 %v2569_v14, %v1388_v2 }
0x21cb   :  { %v1481_v15 = vpop.permute.xlu0 %1480 }
0x21cc   :  { %v1483_v49 = vmul.f32 %v2569_v14, %v1481_v15 }
0x21ce   :  { %1485 = vrot.lane.b32.xlu1 %v1483_v49, %s2634_s30 }
0x2240   :  { %v1486_v17 = vpop.permute.xlu1 %1485 }
0x2241   :  { %v1488_v18 = vadd.f32 %v1486_v17, %v1478_v16 }
0x2243   :  { %2570 = vtanh.f32 %v1488_v18 }
0x224d   :  { %v2571_v61 = vpop.eup %2570 }
0x224e   :  { %1491 = vrot.lane.b32.xlu0 %v2571_v61, %s2629_s26 }
0x22c0   :  { %v1492_v8 = vpop.permute.xlu0 %1491 }
0x22c1   :  { %v1494_v19 = vmul.f32 %v2569_v14, %v1492_v8 }
0x22c3   :  { %1496 = vrot.lane.b32.xlu1 %v1494_v19, %s2634_s30 }
0x2335   :  { %v1497_v52 = vpop.permute.xlu1 %1496 }
0x2336   :  { %2320 = vmatmul.mubr.msk.f32.vlgmr.msra.gmra.mrb[26].mxu0 %vm286_vm2, %v1497_v52 }
0x2337   :  { %2450 = vmatpush3.bf16.msra.mxu0 %v2912_v37  ;;  %2341 = vmatprep.mubr.msk.f32.mxu0 %vm2631_vm1, %v2632_v30 }
0x2338   :  { %2451 = vmatprep.subr.bf16.mxu0 %v2630_v21 }
0x233b   :  { %2453 = vmatpush3.bf16.msra.mxu0 %v2918_v39 }
0x2409   :  { %v1566_v20 = vpop.f32.mrb[26].mxu0 }
0x240a   :  { %v1570_v23 = vadd.f32 %v1566_v20, %v2808_v59  ;;  %v2321_v25 = vpop.f32.mrb[27].mxu0  ;;  %v26_v59 = vld [vmem:[%s3113_s1 + $0x48] sm:$0xff] }
0x240b   :  { %v2454_v34 = vpack.c.bf16 %v27_v33, %v26_v59 }
0x240c   :  { %2572 = vtanh.f32 %v1570_v23  ;;  %v2028_v27 = vmul.f32 -1.442695, %v1570_v23 }
0x240d   :  { %2455 = vmatprep.subr.bf16.mxu1 %v2454_v34 }
0x240e   :  { %2574 = vpow2.f32 %v2028_v27 }
0x2416   :  { %v2573_v26 = vpop.eup %2572 }
0x2417   :  { %1580 = vrot.lane.b32.xlu0 %v2573_v26, %s2629_s26 }
0x2418   :  { %v2575_v28 = vpop.eup %2574 }
0x2419   :  { %v1574_v31 = vadd.f32 1.0, %v2575_v28 }
0x241b   :  { %2576 = vrcp.f32 %v1574_v31 }
0x2425   :  { %v2577_v37 = vpop.eup %2576 }
0x2426   :  { %v1578_v21 = vmul.f32 %v2577_v37, %v1488_v18 }
0x2489   :  { %v1581_v46 = vpop.permute.xlu0 %1580 }
0x248a   :  { %v1583_v30 = vmul.f32 %v2577_v37, %v1581_v46 }
0x248c   :  { %1585 = vrot.lane.b32.xlu1 %v1583_v30, %s2634_s30 }
0x24fe   :  { %v1586_v39 = vpop.permute.xlu1 %1585 }
0x24ff   :  { %v3015_v32 = vadd.f32 %v1586_v39, %v1578_v21 }
0x2501   :  { %2578 = vtanh.f32 %v3015_v32 }
0x250b   :  { %v2579_v48 = vpop.eup %2578 }
0x250c   :  { %1591 = vrot.lane.b32.xlu0 %v2579_v48, %s2629_s26 }
0x257e   :  { %v1592_v35 = vpop.permute.xlu0 %1591 }
0x257f   :  { %v1594_v36 = vmul.f32 %v2577_v37, %v1592_v35 }
0x2581   :  { %1596 = vrot.lane.b32.xlu1 %v1594_v36, %s2634_s30 }
0x25f3   :  { %v1597_v22 = vpop.permute.xlu1 %1596 }
0x25f4   :  { %2331 = vmatmul.mubr.msk.f32.vlgmr.msra.gmra.mrb[14].mxu1 %vm286_vm2, %v1597_v22 }
0x25f5   :  { %2457 = vmatpush3.bf16.msra.mxu1 %v2454_v34  ;;  %2352 = vmatprep.mubr.msk.f32.mxu1 %vm286_vm2, %v2947_v9 }
0x25f6   :  { %2459 = vmatprep.subr.bf16.mxu1 %v2458_v40 }
0x25f9   :  { %2461 = vmatpush3.bf16.msra.mxu1 %v2458_v40 }
0x25fc   :  { %2353 = vmatmul.mubr.msk.f32.vlgmr.msra.gmra.mrb[16].mxu1 %vm286_vm2, %v2962_v24  ;;  %v2628_v24 = vld [vmem:[%s3115_s2] sm:$0x7] }
0x25fd   :  { %2355 = vmatprep.mubr.msk.f32.mxu1 %vm286_vm2, %v2977_v41  ;;  %v3051_v41 = vrot.slane %v2628_v24, %v1907_v47 }
0x2600   :  { %2356 = vmatmul.mubr.msk.f32.gmra.mrb[18].mxu1 %vm286_vm2, %v2992_v3 }
0x2601   :  { %2358 = vmatprep.mubr.msk.f32.mxu1 %vm286_vm2, %v1497_v52 }
0x2604   :  { %2359 = vmatmul.mubr.msk.f32.gmra.mrb[20].mxu1 %vm286_vm2, %v1597_v22 }
0x26c7   :  { %v1666_v42 = vpop.f32.mrb[14].mxu1 }
0x26c8   :  { %v3044_v44 = vadd.f32 %v1666_v42, %v2817_v1  ;;  %v2332_v9 = vpop.f32.mrb[15].mxu1 }
0x26ca   :  { %2580 = vtanh.f32 %v3044_v44  ;;  %v2030_v27 = vmul.f32 -1.442695, %v3044_v44 }
0x26cf   :  { %v2354_v29 = vpop.f32.mrb[16].mxu1 }
0x26d0   :  { %v1910_v51 = vadd.f32 %v2354_v29, %v3051_v41  ;;  %v1866_v54 = vpop.f32.mrb[17].mxu1 }
0x26d1   :  { %v1909_v45 = vadd.f32 %v3051_v41, %v1866_v54 }
0x26d2   :  { %v2042_v56 = vmul.f32 -1.442695, %v1910_v51 }
0x26d3   :  { %v2041_v1 = vmul.f32 -1.442695, %v1909_v45  ;;  %v2357_v58 = vpop.f32.mrb[18].mxu1 }
0x26d4   :  { %v2581_v60 = vpop.eup %2580  ;;  %2582 = vpow2.f32 %v2042_v56  ;;  %v1912_v4 = vadd.f32 %v2357_v58, %v3051_v41  ;;  %v1876_v62 = vpop.f32.mrb[19].mxu1 }
0x26d5   :  { %2584 = vpow2.f32 %v2041_v1  ;;  %v1911_v0 = vadd.f32 %v3051_v41, %v1876_v62  ;;  %1680 = vrot.lane.b32.xlu0 %v2581_v60, %s2629_s26 }
0x26d6   :  { %v2044_v2 = vmul.f32 -1.442695, %v1912_v4 }
0x26d7   :  { %v2043_v55 = vmul.f32 -1.442695, %v1911_v0  ;;  %v2360_v50 = vpop.f32.mrb[20].mxu1 }
0x26d8   :  { %2586 = vpow2.f32 %v2044_v2  ;;  %v1914_v53 = vadd.f32 %v2360_v50, %v3051_v41  ;;  %v1886_v3 = vpop.f32.mrb[21].mxu1 }
0x26d9   :  { %v1913_v5 = vadd.f32 %v3051_v41, %v1886_v3  ;;  %2588 = vpow2.f32 %v2043_v55 }
0x26da   :  { %v2046_v6 = vmul.f32 -1.442695, %v1914_v53 }
0x26db   :  { %v2045_v10 = vmul.f32 -1.442695, %v1913_v5 }
0x26dc   :  { %2590 = vpow2.f32 %v2046_v6 }
0x26dd   :  { %2592 = vpow2.f32 %v2045_v10 }
0x26de   :  { %v2583_v11 = vpop.eup %2582 }
0x26df   :  { %v2585_v43 = vpop.eup %2584  ;;  %v1942_v12 = vadd.f32 1.0, %v2583_v11 }
0x26e0   :  { %v1941_v13 = vadd.f32 1.0, %v2585_v43 }
0x26e1   :  { %2594 = vrcp.f32 %v1942_v12 }
0x26e2   :  { %v2587_v14 = vpop.eup %2586  ;;  %2596 = vrcp.f32 %v1941_v13 }
0x26e3   :  { %v1944_v15 = vadd.f32 1.0, %v2587_v14  ;;  %v2589_v49 = vpop.eup %2588 }
0x26e4   :  { %v1943_v16 = vadd.f32 1.0, %v2589_v49 }
0x26e5   :  { %2598 = vrcp.f32 %v1944_v15 }
0x26e6   :  { %v2591_v17 = vpop.eup %2590  ;;  %2600 = vrcp.f32 %v1943_v16 }
0x26e7   :  { %v2593_v18 = vpop.eup %2592  ;;  %v1946_v61 = vadd.f32 1.0, %v2591_v17 }
0x26e8   :  { %v1945_v8 = vadd.f32 1.0, %v2593_v18 }
0x26e9   :  { %2602 = vrcp.f32 %v1946_v61 }
0x26ea   :  { %2604 = vrcp.f32 %v1945_v8 }
0x26eb   :  { %v2595_v19 = vpop.eup %2594  ;;  %2606 = vpow2.f32 %v2030_v27 }
0x26ec   :  { %v2597_v52 = vpop.eup %2596  ;;  %1967 = vst.msk [vmem:[%s3117_s3 + $0x8] sm:$0xff] %vm1965_vm3, %v2595_v19 }
0x26ed   :  { %1966 = vst.msk [vmem:[%s3117_s3] sm:$0xff] %vm1965_vm3, %v2597_v52 }
0x26ef   :  { %v2599_v20 = vpop.eup %2598 }
0x26f0   :  { %1969 = vst.msk [vmem:[%s3117_s3 + $0x18] sm:$0xff] %vm1965_vm3, %v2599_v20  ;;  %v2601_v23 = vpop.eup %2600 }
0x26f1   :  { %1968 = vst.msk [vmem:[%s3117_s3 + $0x10] sm:$0xff] %vm1965_vm3, %v2601_v23 }
0x26f3   :  { %v2603_v25 = vpop.eup %2602 }
0x26f4   :  { %v2605_v26 = vpop.eup %2604  ;;  %1971 = vst.msk [vmem:[%s3117_s3 + $0x28] sm:$0xff] %vm1965_vm3, %v2603_v25 }
0x26f5   :  { %1970 = vst.msk [vmem:[%s3117_s3 + $0x20] sm:$0xff] %vm1965_vm3, %v2605_v26  ;;  %v2607_v28 = vpop.eup %2606 }
0x26f6   :  { %v1674_v31 = vadd.f32 1.0, %v2607_v28 }
0x26f8   :  { %2608 = vrcp.f32 %v1674_v31 }
0x2702   :  { %v2609_v37 = vpop.eup %2608 }
0x2703   :  { %v1678_v21 = vmul.f32 %v2609_v37, %v3015_v32 }
0x2747   :  { %v1681_v46 = vpop.permute.xlu0 %1680 }
0x2748   :  { %v1683_v30 = vmul.f32 %v2609_v37, %v1681_v46 }
0x274a   :  { %1685 = vrot.lane.b32.xlu1 %v1683_v30, %s2634_s30 }
0x27bc   :  { %v1686_v39 = vpop.permute.xlu1 %1685 }
0x27bd   :  { %v1688_v59 = vadd.f32 %v1686_v39, %v1678_v21 }
0x27bf   :  { %2610 = vtanh.f32 %v1688_v59 }
0x27c9   :  { %v2611_v33 = vpop.eup %2610 }
0x27ca   :  { %1691 = vrot.lane.b32.xlu0 %v2611_v33, %s2629_s26 }
0x283c   :  { %v1692_v34 = vpop.permute.xlu0 %1691 }
0x283d   :  { %v1694_v48 = vmul.f32 %v2609_v37, %v1692_v34 }
0x283f   :  { %1696 = vrot.lane.b32.xlu1 %v1694_v48, %s2634_s30 }
0x28b1   :  { %v1697_v35 = vpop.permute.xlu1 %1696 }
0x28b2   :  { %2342 = vmatmul.mubr.msk.f32.vlgmr.msra.gmra.mrb[28].mxu0 %vm286_vm2, %v1697_v35  ;;  %2361 = vmatprep.mubr.msk.f32.mxu1 %vm286_vm2, %v1697_v35 }
0x2985   :  { %v1766_v36 = vpop.f32.mrb[28].mxu0 }
0x2986   :  { %v1770_v38 = vadd.f32 %v1766_v36, %v2814_v63  ;;  %v2343_v57 = vpop.f32.mrb[29].mxu0 }
0x2988   :  { %2612 = vtanh.f32 %v1770_v38  ;;  %v2032_v40 = vmul.f32 -1.442695, %v1770_v38 }
0x298a   :  { %2614 = vpow2.f32 %v2032_v40 }
0x2992   :  { %v2613_v32 = vpop.eup %2612 }
0x2993   :  { %1780 = vrot.lane.b32.xlu0 %v2613_v32, %s2629_s26 }
0x2994   :  { %v2615_v22 = vpop.eup %2614 }
0x2995   :  { %v1774_v42 = vadd.f32 1.0, %v2615_v22 }
0x2997   :  { %2616 = vrcp.f32 %v1774_v42 }
0x29a1   :  { %v2617_v44 = vpop.eup %2616 }
0x29a2   :  { %v1778_v24 = vmul.f32 %v2617_v44, %v1688_v59 }
0x2a05   :  { %v1781_v9 = vpop.permute.xlu0 %1780 }
0x2a06   :  { %v1783_v47 = vmul.f32 %v2617_v44, %v1781_v9 }
0x2a08   :  { %1785 = vrot.lane.b32.xlu1 %v1783_v47, %s2634_s30 }
0x2a7a   :  { %v1786_v29 = vpop.permute.xlu1 %1785 }
0x2a7b   :  { %v1788_v51 = vadd.f32 %v1786_v29, %v1778_v24 }
0x2a7d   :  { %2618 = vtanh.f32 %v1788_v51 }
0x2a87   :  { %v2619_v63 = vpop.eup %2618 }
0x2a88   :  { %1791 = vrot.lane.b32.xlu0 %v2619_v63, %s2629_s26 }
0x2a8c   :  { %994 = vrot.lane.b32.xlu0 %v2900_v7, %s2633_s24 }
0x2afa   :  { %v1792_v54 = vpop.permute.xlu0 %1791 }
0x2afb   :  { %v1794_v45 = vmul.f32 %v2617_v44, %v1792_v54 }
0x2afd   :  { %1796 = vrot.lane.b32.xlu1 %v1794_v45, %s2634_s30 }
0x2afe   :  { %v995_v56 = vpop.permute.xlu0 %994 }
0x2aff   :  { %997 = vst.msk [vmem:[%s3118_s5] sm:$0xff] %vm286_vm2, %v995_v56 }
0x2b6f   :  { %v1797_v1 = vpop.permute.xlu1 %1796 }
0x2b70   :  { %2362 = vmatmul.mubr.msk.f32.gmra.mrb[22].mxu1 %vm286_vm2, %v1797_v1 }
0x2c43   :  { %v2363_v58 = vpop.f32.mrb[22].mxu1 }
0x2c44   :  { %v1916_v60 = vadd.f32 %v2363_v58, %v3051_v41  ;;  %v1896_v4 = vpop.f32.mrb[23].mxu1 }
0x2c45   :  { %v1915_v62 = vadd.f32 %v3051_v41, %v1896_v4 }
0x2c46   :  { %v2048_v7 = vmul.f32 -1.442695, %v1916_v60 }
0x2c47   :  { %v2047_v0 = vmul.f32 -1.442695, %v1915_v62 }
0x2c48   :  { %2620 = vpow2.f32 %v2048_v7 }
0x2c49   :  { %2622 = vpow2.f32 %v2047_v0 }
0x2c52   :  { %v2621_v2 = vpop.eup %2620 }
0x2c53   :  { %v2623_v55 = vpop.eup %2622  ;;  %v1948_v50 = vadd.f32 1.0, %v2621_v2 }
0x2c54   :  { %v1947_v53 = vadd.f32 1.0, %v2623_v55 }
0x2c55   :  { %2624 = vrcp.f32 %v1948_v50 }
0x2c56   :  { %2626 = vrcp.f32 %v1947_v53 }
0x2c5f   :  { %v2625_v3 = vpop.eup %2624 }
0x2c60   :  { %v2627_v5 = vpop.eup %2626  ;;  %1973 = vst.msk [vmem:[%s3117_s3 + $0x38] sm:$0xff] %vm1965_vm3, %v2625_v3 }
0x2c61   :  { %1972 = vst.msk [vmem:[%s3117_s3 + $0x30] sm:$0xff] %vm1965_vm3, %v2627_v5 }

</bundles_post_ra>
